<compile_context>
chip_gen: v5e
topology: v5e:2x2
jax: 0.10.0
libtpu: 0.0.40
codegen_flags: <defaults>
</compile_context>

<pallas_src>
import functools
import math

import jax
import jax.numpy as jnp
from jax.experimental import pallas as pl
from jax.experimental.pallas import tpu as pltpu


# ---------------------------------------------------------------------------
# Pallas kernel
# ---------------------------------------------------------------------------

def _self_attention_adj_kernel(x_ref, qw_ref, kw_ref, o_ref, q_scr, k_scr, *,
                               tile_n, neg_slope):
    """One (batch, column-tile) block of softmax(LReLU(xT Q) LReLU(xT K)^T, dim=1)."""
    j = pl.program_id(1)

    # ---- per-batch projections, hoisted out of the column-tile loop ----------
    @pl.when(j == 0)
    def _project():
        xf = x_ref[0]                                               # (N, C)
        q = jnp.dot(xf, qw_ref[...], preferred_element_type=jnp.float32)  # (N, A)
        k = jnp.dot(xf, kw_ref[...], preferred_element_type=jnp.float32)  # (N, A)
        # LeakyReLU epilogue on the VPU (hidden under MXU work).
        q = jnp.where(q >= 0.0, q, neg_slope * q)
        k = jnp.where(k >= 0.0, k, neg_slope * k)
        q_scr[...] = q.astype(q_scr.dtype)
        k_scr[...] = k.astype(k_scr.dtype)

    # ---- scores for this column tile: s[i, jj] = <Q_i, K_(j*TN+jj)> ----------
    col0 = pl.multiple_of(j * tile_n, tile_n)
    k_tile = k_scr[pl.ds(col0, tile_n), :]                          # (TN, A)
    s = jax.lax.dot_general(q_scr[...], k_tile,
                            (((1,), (1,)), ((), ())),
                            preferred_element_type=jnp.float32)     # (N, TN)

    # ---- softmax over dim=1 of the (B, N, N) output == axis 0 of this tile ---
    m = jnp.max(s, axis=0, keepdims=True)
    e = jnp.exp(s - m)
    denom = jnp.sum(e, axis=0, keepdims=True)                       # (1, TN)
    inv = pl.reciprocal(denom, approx=True)
    o_ref[0] = (e * inv).astype(o_ref.dtype)


# ---------------------------------------------------------------------------
# Wrapper: grid + BlockSpecs
# ---------------------------------------------------------------------------

def _pick_tile_n(N, tile_n):
    """Largest multiple of 128 that is <= tile_n and divides N (fallback: N)."""
    if N % 128 != 0:
        return N
    tn = min((tile_n - tile_n % 128) or 128, N)
    while N % tn != 0:
        tn -= 128
    return tn


def self_attention_adj(x, queue, key, *, tile_n=256, neg_slope=0.01,
                       compute_dtype=jnp.bfloat16, out_dtype=jnp.float32):
    """x: (B, C, N); queue/key: (C, A) -> (B, N, N) = softmax(QK^T, dim=1)."""
    B, C, N = x.shape
    Cq, A = queue.shape
    assert Cq == C and key.shape == (C, A)

    tn = _pick_tile_n(N, tile_n)
    nj = N // tn

    # transpose(1, 2) fused with the compute-dtype downcast (one XLA pass).
    # TODO(synk): move in-kernel (transposed dot_general on a (C, N) block) to skip
    #             this HBM round trip entirely for large C.
    xt = jnp.swapaxes(x, 1, 2).astype(compute_dtype)                # (B, N, C)
    qw = queue.astype(compute_dtype)
    kw = key.astype(compute_dtype)

    kernel = functools.partial(_self_attention_adj_kernel,
                               tile_n=tn, neg_slope=neg_slope)

    in_itemsize = jnp.dtype(compute_dtype).itemsize
    out_itemsize = jnp.dtype(out_dtype).itemsize
    cost = pl.CostEstimate(
        # projections once per batch + scores matmul once per output element
        flops=B * (4 * N * C * A + 2 * N * N * A),
        transcendentals=B * N * N,
        bytes_accessed=(B * N * C + 2 * C * A) * in_itemsize
                       + B * N * N * out_itemsize,
    )

    return pl.pallas_call(
        kernel,
        out_shape=jax.ShapeDtypeStruct((B, N, N), out_dtype),
        grid_spec=pltpu.PrefetchScalarGridSpec(
            num_scalar_prefetch=0,
            grid=(B, nj),
            in_specs=[
                # full sequence once per batch: block index constant over j -> resident
                pl.BlockSpec((1, N, C), lambda b, j: (b, 0, 0)),
                # weights: resident across the whole grid
                pl.BlockSpec((C, A), lambda b, j: (0, 0)),
                pl.BlockSpec((C, A), lambda b, j: (0, 0)),
            ],
            out_specs=pl.BlockSpec((1, N, tn), lambda b, j: (b, 0, j)),
            scratch_shapes=[
                pltpu.VMEM((N, A), compute_dtype),   # Q (per-batch, persists over j)
                pltpu.VMEM((N, A), compute_dtype),   # K
            ],
        ),
        compiler_params=pltpu.CompilerParams(
            # batch axis split across TensorCores; j must be "arbitrary" because the
            # @pl.when(j == 0) scratch init carries state along j.
            dimension_semantics=("parallel", "arbitrary"),
        ),
        cost_estimate=cost,
    )(xt, qw, kw)


# ---------------------------------------------------------------------------
# Pure-JAX reference (numerics-matched to the requested compute dtype)
# ---------------------------------------------------------------------------

def self_attention_adj_ref(x, queue, key, neg_slope=0.01,
                           compute_dtype=jnp.float32):
    xt = jnp.swapaxes(x, 1, 2).astype(compute_dtype)                # (B, N, C)
    qw = queue.astype(compute_dtype)
    kw = key.astype(compute_dtype)
    lrelu = lambda v: jnp.where(v >= 0.0, v, neg_slope * v)
    q = lrelu(jnp.einsum("bnc,ca->bna", xt, qw,
                         preferred_element_type=jnp.float32)).astype(compute_dtype)
    k = lrelu(jnp.einsum("bnc,ca->bna", xt, kw,
                         preferred_element_type=jnp.float32)).astype(compute_dtype)
    s = jnp.einsum("bia,bja->bij", q, k, preferred_element_type=jnp.float32)
    return jax.nn.softmax(s, axis=1)


# ---------------------------------------------------------------------------
if __name__ == "__main__":
    key0 = jax.random.PRNGKey(0)
    kx, kq, kk = jax.random.split(key0, 3)

    # Small demo configuration (feature_size=C, attention_size=A, N graph nodes).
    B, C, N, A = 2, 64, 256, 128

    x = jax.random.normal(kx, (B, C, N), jnp.float32)
    # kaiming_uniform_-style init (fan_in = attention_size for a (C, A) tensor in torch)
    bound = math.sqrt(6.0 / A)
    queue_w = jax.random.uniform(kq, (C, A), jnp.float32, -bound, bound)
    key_w = jax.random.uniform(kk, (C, A), jnp.float32, -bound, bound)

    # --- fast path: bf16 MXU operands, f32 accumulation + f32 softmax ---------
    fwd_bf16 = jax.jit(functools.partial(self_attention_adj,
                                         compute_dtype=jnp.bfloat16))
    out = jax.block_until_ready(fwd_bf16(x, queue_w, key_w))
    assert out.shape == (B, N, N), out.shape
    assert bool(jnp.all(jnp.isfinite(out)))
    # softmax(dim=1): every column sums to 1 (approx-reciprocal fuzz allowed)
    assert bool(jnp.allclose(jnp.sum(out, axis=1), 1.0, atol=5e-3))
    ref_bf16 = self_attention_adj_ref(x, queue_w, key_w,
                                      compute_dtype=jnp.bfloat16)
    assert bool(jnp.allclose(out, ref_bf16, atol=1e-2, rtol=1e-2)), \
        float(jnp.max(jnp.abs(out - ref_bf16)))

    # --- numerics check: f32 path against the f32 reference -------------------
    fwd_f32 = jax.jit(functools.partial(self_attention_adj,
                                        compute_dtype=jnp.float32))
    out_f32 = jax.block_until_ready(fwd_f32(x, queue_w, key_w))
    ref_f32 = self_attention_adj_ref(x, queue_w, key_w,
                                     compute_dtype=jnp.float32)
    assert bool(jnp.allclose(out_f32, ref_f32, atol=2e-3, rtol=2e-3)), \
        float(jnp.max(jnp.abs(out_f32 - ref_f32)))
    assert bool(jnp.allclose(jnp.sum(out_f32, axis=1), 1.0, atol=5e-3))

    print("KERNEL_OK")
</pallas_src>

<mosaic_0001>
module attributes {stable_mosaic.version = 11 : i64} {
  func.func @_self_attention_adj_kernel(%arg0: i32, %arg1: i32, %arg2: memref<1x256x64xbf16, #tpu.memory_space<vmem>>, %arg3: memref<64x128xbf16, #tpu.memory_space<vmem>>, %arg4: memref<64x128xbf16, #tpu.memory_space<vmem>>, %arg5: memref<1x256x256xf32, #tpu.memory_space<vmem>>, %arg6: memref<256x128xbf16, #tpu.memory_space<vmem>>, %arg7: memref<256x128xbf16, #tpu.memory_space<vmem>>) attributes {dimension_semantics = [#tpu.dimension_semantics<parallel>, #tpu.dimension_semantics<arbitrary>], iteration_bounds = array<i64: 2, 1>, scalar_prefetch = 0 : i64, scratch_operands = 2 : i64, tpu.core_type = #tpu.core_type<tc>, window_params = [{transform_indices = @transform_0, window_bounds = array<i64: 1, 256, 64>}, {pipeline_mode = #tpu.pipeline_mode<synchronous>, transform_indices = @transform_1, window_bounds = array<i64: 64, 128>}, {pipeline_mode = #tpu.pipeline_mode<synchronous>, transform_indices = @transform_2, window_bounds = array<i64: 64, 128>}, {transform_indices = @transform_3, window_bounds = array<i64: 1, 256, 256>}]} {
    %c0_i32 = arith.constant 0 : i32
    %0 = arith.cmpi eq, %arg1, %c0_i32 : i32
    %1 = arith.extui %0 : i1 to i32
    %c0_i32_0 = arith.constant 0 : i32
    %2 = arith.cmpi ne, %1, %c0_i32_0 : i32
    scf.if %2 {
      %c0_8 = arith.constant 0 : index
      %c0_9 = arith.constant 0 : index
      %c0_10 = arith.constant 0 : index
      %22 = vector.load %arg2[%c0_8, %c0_9, %c0_10] : memref<1x256x64xbf16, #tpu.memory_space<vmem>>, vector<1x256x64xbf16>
      %23 = vector.shape_cast %22 : vector<1x256x64xbf16> to vector<256x64xbf16>
      %c0_11 = arith.constant 0 : index
      %c0_12 = arith.constant 0 : index
      %24 = vector.load %arg3[%c0_11, %c0_12] : memref<64x128xbf16, #tpu.memory_space<vmem>>, vector<64x128xbf16>
      %cst_13 = arith.constant dense<0.000000e+00> : vector<256x128xf32>
      %25 = tpu.matmul %23, %24, %cst_13 {dimension_numbers = #tpu.dot_dimension_numbers<[1], [0], [0], [1], [0, 0, 1, 1], [], []>} : vector<256x64xbf16>, vector<64x128xbf16>, vector<256x128xf32> -> vector<256x128xf32>
      %c0_14 = arith.constant 0 : index
      %c0_15 = arith.constant 0 : index
      %26 = vector.load %arg4[%c0_14, %c0_15] : memref<64x128xbf16, #tpu.memory_space<vmem>>, vector<64x128xbf16>
      %cst_16 = arith.constant dense<0.000000e+00> : vector<256x128xf32>
      %27 = tpu.matmul %23, %26, %cst_16 {dimension_numbers = #tpu.dot_dimension_numbers<[1], [0], [0], [1], [0, 0, 1, 1], [], []>} : vector<256x64xbf16>, vector<64x128xbf16>, vector<256x128xf32> -> vector<256x128xf32>
      %cst_17 = arith.constant 0.000000e+00 : f32
      %28 = vector.broadcast %cst_17 : f32 to vector<256x128xf32>
      %29 = arith.cmpf oge, %25, %28 : vector<256x128xf32>
      %cst_18 = arith.constant 0.00999999977 : f32
      %30 = vector.broadcast %cst_18 : f32 to vector<256x128xf32>
      %31 = arith.mulf %30, %25 : vector<256x128xf32>
      %32 = arith.select %29, %25, %31 : vector<256x128xi1>, vector<256x128xf32>
      %cst_19 = arith.constant 0.000000e+00 : f32
      %33 = vector.broadcast %cst_19 : f32 to vector<256x128xf32>
      %34 = arith.cmpf oge, %27, %33 : vector<256x128xf32>
      %cst_20 = arith.constant 0.00999999977 : f32
      %35 = vector.broadcast %cst_20 : f32 to vector<256x128xf32>
      %36 = arith.mulf %35, %27 : vector<256x128xf32>
      %37 = arith.select %34, %27, %36 : vector<256x128xi1>, vector<256x128xf32>
      %38 = arith.truncf %32 : vector<256x128xf32> to vector<256x128xbf16>
      %c0_21 = arith.constant 0 : index
      %c0_22 = arith.constant 0 : index
      %39 = vector.load %arg6[%c0_21, %c0_22] : memref<256x128xbf16, #tpu.memory_space<vmem>>, vector<256x128xbf16>
      tpu.vector_store %arg6[%c0_21, %c0_22], %38 {strides = array<i32>} : memref<256x128xbf16, #tpu.memory_space<vmem>>, vector<256x128xbf16>,
      %40 = arith.truncf %37 : vector<256x128xf32> to vector<256x128xbf16>
      %c0_23 = arith.constant 0 : index
      %c0_24 = arith.constant 0 : index
      %41 = vector.load %arg7[%c0_23, %c0_24] : memref<256x128xbf16, #tpu.memory_space<vmem>>, vector<256x128xbf16>
      tpu.vector_store %arg7[%c0_23, %c0_24], %40 {strides = array<i32>} : memref<256x128xbf16, #tpu.memory_space<vmem>>, vector<256x128xbf16>,
    } else {
    }
    %c256_i32 = arith.constant 256 : i32
    %3 = arith.muli %arg1, %c256_i32 : i32
    %4 = tpu.assume_multiple %3, 256 : i32
    %5 = arith.index_cast %4 : i32 to index
    %c0 = arith.constant 0 : index
    %6 = vector.load %arg7[%5, %c0] : memref<256x128xbf16, #tpu.memory_space<vmem>>, vector<256x128xbf16>
    %c0_1 = arith.constant 0 : index
    %c0_2 = arith.constant 0 : index
    %7 = vector.load %arg6[%c0_1, %c0_2] : memref<256x128xbf16, #tpu.memory_space<vmem>>, vector<256x128xbf16>
    %cst = arith.constant dense<0.000000e+00> : vector<256x256xf32>
    %8 = tpu.matmul %7, %6, %cst {dimension_numbers = #tpu.dot_dimension_numbers<[1], [1], [0], [0], [0, 0, 1, 0], [], []>} : vector<256x128xbf16>, vector<256x128xbf16>, vector<256x256xf32> -> vector<256x256xf32>
    %cst_3 = arith.constant dense<0xFF800000> : vector<256xf32>
    %9 = vector.multi_reduction <maximumf>, %8, %cst_3 [0] : vector<256x256xf32> to vector<256xf32>
    %10 = vector.shape_cast %9 : vector<256xf32> to vector<1x256xf32>
    %11 = vector.broadcast %10 : vector<1x256xf32> to vector<256x256xf32>
    %12 = arith.subf %8, %11 : vector<256x256xf32>
    %13 = math.exp %12 : vector<256x256xf32>
    %cst_4 = arith.constant dense<0.000000e+00> : vector<256xf32>
    %14 = vector.multi_reduction <add>, %13, %cst_4 [0] : vector<256x256xf32> to vector<256xf32>
    %15 = vector.shape_cast %14 : vector<256xf32> to vector<1x256xf32>
    %16 = tpu.reciprocal %15 {approx = true} : vector<1x256xf32> -> vector<1x256xf32>
    %17 = vector.broadcast %16 : vector<1x256xf32> to vector<256x256xf32>
    %18 = arith.mulf %13, %17 : vector<256x256xf32>
    %c0_5 = arith.constant 0 : index
    %c0_6 = arith.constant 0 : index
    %c0_7 = arith.constant 0 : index
    %19 = vector.load %arg5[%c0_5, %c0_6, %c0_7] : memref<1x256x256xf32, #tpu.memory_space<vmem>>, vector<1x256x256xf32>
    %20 = vector.shape_cast %19 : vector<1x256x256xf32> to vector<256x256xf32>
    %21 = vector.shape_cast %18 : vector<256x256xf32> to vector<1x256x256xf32>
    tpu.vector_store %arg5[%c0_5, %c0_6, %c0_7], %21 {strides = array<i32>} : memref<1x256x256xf32, #tpu.memory_space<vmem>>, vector<1x256x256xf32>,
    return
  }
  func.func @transform_0(%arg0: i32, %arg1: i32) -> (i32, i32, i32) {
    %c0_i32 = arith.constant 0 : i32
    %c0_i32_0 = arith.constant 0 : i32
    %c0_i32_1 = arith.constant 0 : i32
    return %arg0, %c0_i32, %c0_i32_0 : i32, i32, i32
  }
  func.func @transform_1(%arg0: i32, %arg1: i32) -> (i32, i32) {
    %c0_i32 = arith.constant 0 : i32
    %c0_i32_0 = arith.constant 0 : i32
    %c0_i32_1 = arith.constant 0 : i32
    return %c0_i32, %c0_i32_0 : i32, i32
  }
  func.func @transform_2(%arg0: i32, %arg1: i32) -> (i32, i32) {
    %c0_i32 = arith.constant 0 : i32
    %c0_i32_0 = arith.constant 0 : i32
    %c0_i32_1 = arith.constant 0 : i32
    return %c0_i32, %c0_i32_0 : i32, i32
  }
  func.func @transform_3(%arg0: i32, %arg1: i32) -> (i32, i32, i32) {
    %c0_i32 = arith.constant 0 : i32
    %c0_i32_0 = arith.constant 0 : i32
    return %arg0, %c0_i32, %arg1 : i32, i32, i32
  }
}

</mosaic_0001>

<bundles_post_ra>
// kernel: self_attention_adj.1
= control target key start
LH: loop header
LB: loop body
LE: loop exit
PB: predicated region body
PF: predicated region fallthrough
CT: control target
= control target key end

     0   :  { %8 = vsyncpa [#allocation5], 0  ;;  %s3608_s0 = inlined_call_operand.vmem [shape: bf16[2,256,64], index: 0, kind: input, shape index: {}]   ;;  %s3609_s1 = inlined_call_operand.vmem [shape: bf16[64,128], index: 1, kind: input, shape index: {}]   ;;  %s3610_s2 = inlined_call_operand.vmem [shape: bf16[64,128], index: 2, kind: input, shape index: {}]   ;;  %s3611_s3 = inlined_call_operand.hbm [shape: f32[2,256,256], index: 3, kind: output, shape index: {}]  }
   0x1   :  { %10 = vsyncpa [#allocation5 + $0x1], 0  ;;  %s2738_s12 = smov 0   ;;  %s2740_s13 = smov 0  }
   0x2   :  { %s2742_s14 = smov 0   ;;  %s2744_s15 = smov 0  }
   0x3   :  { %s2746_s16 = smov 0   ;;  %s2748_s17 = smov 0  }
   0x4 LB: > { %s1914_s18 = sadd.s32 4294967295, %s2714_s17   ;;  %s1915_s19 = sadd.s32 4294967294, %s2714_s17   ;;  %s2714_s17 = sphi %s2748_s17, %s16_s17   ;;  %s2710_s16 = sphi %s2746_s16, %s3651_s16   ;;  %s2706_s15 = sphi %s2744_s15, %s3650_s15   ;;  %s2702_s14 = sphi %s2742_s14, %s3649_s14   ;;  %s2698_s13 = sphi %s2740_s13, %s3648_s13   ;;  %s2694_s12 = sphi %s2738_s12, %s3647_s12  }
   0x5   : > { %s28_s20 = sadd.s32 1, %s2710_s16  ;;  %s105_s21 = sadd.s32 1, %s2702_s14 }
   0x6   : > { %p30_p0 = scmp.ge.s32.totalorder %s28_s20, 2  ;;  %p115_p1 = scmp.ne.s32.totalorder %s2702_s14, %s2698_s13 }
   0x7   : > { %p116_p2 = scmp.eq.s32.totalorder %s1914_s18, 1  ;;  %p121_p3 = scmp.ne.s32.totalorder %s2698_s13, %s2694_s12 }
   0x8   : > { %s3653_s20 = smov (%p30_p0, %s28_s20), 0  ;;  %p122_p5 = scmp.eq.s32.totalorder %s1915_s19, 1 }
   0x9   : > { %p2778_p4 = por %p116_p2, %p115_p1  ;;  %s100_s23 = ssub.s32 %s2710_s16, %s3653_s20 }
   0xa   : > { %p1918_p6 = scmp.ge.s32.totalorder %s2714_s17, 1  ;;  %p103_p7 = scmp.eq.s32.totalorder %s100_s23, 0 }
   0xb   : > { %p2785_p8 = por %p122_p5, %p121_p3  ;;  %p154_p9 = scmp.lt.s32.totalorder %s2714_s17, 3 }
   0xc   : > { %s2791_s25 = scalar_select %p103_p7, %s2702_s14, %s105_s21  }
   0xd   : > { %p155_p10 = pnand %p1918_p6, %p154_p9 }
   0xf   : > { %158 = sbr.rel (%p155_p10) target bundleno = 997 (0x3e5), region = 32 }
  0x14   : > { %v2207_v0 = vld [vmem:[%s3610_s2 + $0x18] sm:$0xff]  ;;  %p178_p11 = scmp.lt.s32.totalorder %s2706_s15, 1  ;;  %v2206_v1 = vld [vmem:[%s3610_s2 + $0x10] sm:$0xff]  ;;  %v2205_v2 = vld [vmem:[%s3610_s2 + $0x8] sm:$0xff]  ;;  %vm333_vm0 = vcmask 523264   ;;  %s2656_s26 = scalar_lea.hbm %s3611_s3, 1024 }
  0x15   : > { %507 = vmatpush.bf16.msra.mxu1 %v2207_v0  ;;  %v2204_v3 = vld [vmem:[%s3610_s2] sm:$0xff]  ;;  %v2203_v12 = vld [vmem:[%s3609_s1 + $0x18] sm:$0xff]  ;;  %v2202_v13 = vld [vmem:[%s3609_s1 + $0x10] sm:$0xff] }
  0x16   : > { %s179_s30 = scalar_select %p178_p11, %s2706_s15, 1  ;;  %386 = vmatpush.bf16.msra.mxu0 %v2203_v12  ;;  %v2201_v14 = vld [vmem:[%s3609_s1 + $0x8] sm:$0xff]  ;;  %v2200_v15 = vld [vmem:[%s3609_s1] sm:$0xff] }
  0x18   : > { %s2183_s6 = sshll.u32 %s179_s30, 7  ;;  %s175_s30 = sand.u32 1, %s2698_s13  }
  0x19   : > { %508 = vmatpush.bf16.msra.mxu1 %v2206_v1  ;;  %s2810_s11 = scalar_lea.vmem %s3608_s0, %s2183_s6  ;;  %s1919_s4 = sshll.u32 %s175_s30, 9 }
  0x1a   : > { %v2184_v4 = vld [vmem:[%s2810_s11] sm:$0xff]  ;;  %v2185_v5 = vld [vmem:[%s2810_s11 + $0x8] sm:$0xff]  ;;  %v2186_v6 = vld [vmem:[%s2810_s11 + $0x10] sm:$0xff]  ;;  %387 = vmatpush.bf16.msra.mxu0 %v2202_v13  ;;  %s3297_s5 = scalar_lea.vmem [#allocation4], %s1919_s4  ;;  %s2240_s6 = sshll.u32 %s2706_s15, 9 }
  0x1b   : > { %v2187_v7 = vld [vmem:[%s2810_s11 + $0x18] sm:$0xff]  ;;  %v2821_v8 = vld [vmem:[%s2810_s11 + $0x20] sm:$0xff]  ;;  %v2826_v9 = vld [vmem:[%s2810_s11 + $0x28] sm:$0xff]  ;;  %s1835_s9 = scalar_lea.hbm %s3611_s3, %s2240_s6  ;;  %s1836_s10 = sshll.u32 %s3297_s5, 4  ;;  %s1837_s10 = int_to_ptr.vmem [resolvable:$true] %s1836_s10 }
  0x1c   : > { %v2831_v10 = vld [vmem:[%s2810_s11 + $0x30] sm:$0xff]  ;;  %v2836_v11 = vld [vmem:[%s2810_s11 + $0x38] sm:$0xff]  ;;  %v2853_v16 = vld [vmem:[%s2810_s11 + $0x40] sm:$0xff]  ;;  %s1822_s15 = scalar_lea.sflag [#allocation5], %s175_s30 }
  0x1d   : > { %509 = vmatpush.bf16.msra.mxu1 %v2205_v2  ;;  %v2859_v24 = vld [vmem:[%s2810_s11 + $0x48] sm:$0xff]  ;;  %v2865_v32 = vld [vmem:[%s2810_s11 + $0x50] sm:$0xff]  ;;  %v2871_v40 = vld [vmem:[%s2810_s11 + $0x58] sm:$0xff] }
  0x1e   : > { %388 = vmatpush.bf16.msra.mxu0 %v2201_v14  ;;  %v2877_v48 = vld [vmem:[%s2810_s11 + $0x60] sm:$0xff]  ;;  %v2884_v56 = vld [vmem:[%s2810_s11 + $0x68] sm:$0xff]  ;;  %v2891_v0 = vld [vmem:[%s2810_s11 + $0x70] sm:$0xff] }
  0x21   : > { %510 = vmatpush.bf16.msra.mxu1 %v2204_v3 }
  0x22   : > { %389 = vmatpush.bf16.msra.mxu0 %v2200_v15 }
  0x24   : > { %2034 = vmatmul.msk.bf16.vlgmr.msra.gmra.mxu1 %vm333_vm0, %v2184_v4 }
  0x25   : > { %2002 = vmatmul.msk.bf16.vlgmr.msra.gmra.mxu0 %vm333_vm0, %v2184_v4 }
  0x34   : > { %2035 = vmatmul.msk.bf16.gmra.mxu1 %vm333_vm0, %v2185_v5 }
  0x35   : > { %2003 = vmatmul.msk.bf16.gmra.mxu0 %vm333_vm0, %v2185_v5 }
  0x44   : > { %2036 = vmatmul.msk.bf16.gmra.mxu1 %vm333_vm0, %v2186_v6 }
  0x45   : > { %2004 = vmatmul.msk.bf16.gmra.mxu0 %vm333_vm0, %v2186_v6 }
  0x54   : > { %2037 = vmatmul.msk.bf16.gmra.mxu1 %vm333_vm0, %v2187_v7 }
  0x55   : > { %2005 = vmatmul.msk.bf16.gmra.mxu0 %vm333_vm0, %v2187_v7 }
  0x64   : > { %2038 = vmatmul.msk.bf16.gmra.mxu1 %vm333_vm0, %v2821_v8 }
  0x65   : > { %2006 = vmatmul.msk.bf16.gmra.mxu0 %vm333_vm0, %v2821_v8  ;;  %v2898_v8 = vld [vmem:[%s2810_s11 + $0x78] sm:$0xff]  ;;  %s1838_s11 = sshll.u32 %s1835_s9, 4  ;;  %s1839_s11 = int_to_ptr.hbm [resolvable:$true] %s1838_s11 }
  0x66   : > { %s2650_s18 = sshra.s32 %s1839_s11, 4  ;;  %s2651_s18 = int_to_ptr.hbm [resolvable:$true] %s2650_s18 }
  0x67   : > { %s2652_s19 = scalar_lea.hbm %s2651_s18, 512  ;;  %p2657_p1 = scmp.lt.s32.totalorder %s2651_s18, %s3611_s3 }
  0x68   : > { %p2653_p12 = scmp.ne.s32.totalorder %s2651_s18, %s2652_s19  ;;  %p2658_p2 = scmp.lt.s32.totalorder %s2656_s26, %s2652_s19 }
  0x6a   : > { %p2654_p13 = pnand %p2653_p12, %p2778_p4  ;;  %p2659_p3 = por %p2658_p2, %p2657_p1 }
  0x6c   : > { %p2655_p0 = pneg %p2654_p13 }
  0x6e   : > { %p2660_p5 = pnand %p2659_p3, %p2655_p0 }
  0x74   : > { %2039 = vmatmul.msk.bf16.gmra.mxu1 %vm333_vm0, %v2826_v9 }
  0x75   : > { %2007 = vmatmul.msk.bf16.gmra.mxu0 %vm333_vm0, %v2826_v9 }
  0x84   : > { %2040 = vmatmul.msk.bf16.gmra.mxu1 %vm333_vm0, %v2831_v10 }
  0x85   : > { %2008 = vmatmul.msk.bf16.gmra.mxu0 %vm333_vm0, %v2831_v10 }
  0x94   : > { %2041 = vmatmul.msk.bf16.gmra.mxu1 %vm333_vm0, %v2836_v11 }
  0x95   : > { %2009 = vmatmul.msk.bf16.gmra.mxu0 %vm333_vm0, %v2836_v11 }
  0xa1   : > { %v512_v17 = vpop.f32.mrf.mxu1 }
  0xa2   : > { %v720_v18 = vmul.f32 0.01, %v512_v17  ;;  %vm688_vm1 = vcmp.ge.f32.partialorder %v512_v17, 0.0 }
  0xa4   : > { %2042 = vmatmul.msk.bf16.gmra.mxu1 %vm333_vm0, %v2853_v16  ;;  %v752_v21 = vsel %vm688_vm1, %v512_v17, %v720_v18  ;;  %v391_v18 = vpop.f32.mrf.mxu0 }
  0xa5   : > { %2010 = vmatmul.msk.bf16.gmra.mxu0 %vm333_vm0, %v2853_v16 }
  0xa9   : > { %v514_v19 = vpop.f32.mrf.mxu1 }
  0xaa   : > { %vm689_vm2 = vcmp.ge.f32.partialorder %v514_v19, 0.0  ;;  %v721_v20 = vmul.f32 0.01, %v514_v19 }
  0xac   : > { %v753_v22 = vsel %vm689_vm2, %v514_v19, %v721_v20  ;;  %v624_v20 = vmul.f32 0.01, %v391_v18  ;;  %vm592_vm2 = vcmp.ge.f32.partialorder %v391_v18, 0.0 }
  0xad   : > { %v2324_v23 = vpack.c.bf16 %v753_v22, %v752_v21  ;;  %v393_v22 = vpop.f32.mrf.mxu0 }
  0xaf   : > { %2325 = vst [vmem:[#allocation3 + $0x28] sm:$0xff] %v2324_v23  }
  0xb1   : > { %v517_v25 = vpop.f32.mrf.mxu1 }
  0xb2   : > { %v722_v26 = vmul.f32 0.01, %v517_v25  ;;  %vm690_vm3 = vcmp.ge.f32.partialorder %v517_v25, 0.0 }
  0xb4   : > { %2043 = vmatmul.msk.bf16.gmra.mxu1 %vm333_vm0, %v2859_v24  ;;  %v754_v29 = vsel %vm690_vm3, %v517_v25, %v722_v26  ;;  %v656_v25 = vsel %vm592_vm2, %v391_v18, %v624_v20  ;;  %v625_v26 = vmul.f32 0.01, %v393_v22 }
  0xb5   : > { %2011 = vmatmul.msk.bf16.gmra.mxu0 %vm333_vm0, %v2859_v24 }
  0xb9   : > { %v519_v27 = vpop.f32.mrf.mxu1 }
  0xba   : > { %vm691_vm4 = vcmp.ge.f32.partialorder %v519_v27, 0.0  ;;  %v723_v28 = vmul.f32 0.01, %v519_v27 }
  0xbc   : > { %v755_v30 = vsel %vm691_vm4, %v519_v27, %v723_v28  ;;  %vm593_vm4 = vcmp.ge.f32.partialorder %v393_v22, 0.0 }
  0xbd   : > { %v2329_v31 = vpack.c.bf16 %v755_v30, %v754_v29  ;;  %v657_v28 = vsel %vm593_vm4, %v393_v22, %v625_v26 }
  0xbf   : > { %2416 = vst [vmem:[#allocation3 + $0x68] sm:$0xff] %v2329_v31   ;;  %v2244_v31 = vpack.c.bf16 %v657_v28, %v656_v25 }
  0xc1   : > { %v522_v33 = vpop.f32.mrf.mxu1  ;;  %2245 = vst [vmem:[#allocation2 + $0x30] sm:$0xff] %v2244_v31  }
  0xc2   : > { %v724_v34 = vmul.f32 0.01, %v522_v33  ;;  %vm692_vm5 = vcmp.ge.f32.partialorder %v522_v33, 0.0 }
  0xc4   : > { %2044 = vmatmul.msk.bf16.gmra.mxu1 %vm333_vm0, %v2865_v32  ;;  %v756_v37 = vsel %vm692_vm5, %v522_v33, %v724_v34  ;;  %v396_v34 = vpop.f32.mrf.mxu0 }
  0xc5   : > { %2012 = vmatmul.msk.bf16.gmra.mxu0 %vm333_vm0, %v2865_v32 }
  0xc9   : > { %v524_v35 = vpop.f32.mrf.mxu1 }
  0xca   : > { %vm693_vm6 = vcmp.ge.f32.partialorder %v524_v35, 0.0  ;;  %v725_v36 = vmul.f32 0.01, %v524_v35 }
  0xcc   : > { %v757_v38 = vsel %vm693_vm6, %v524_v35, %v725_v36  ;;  %v626_v36 = vmul.f32 0.01, %v396_v34  ;;  %vm594_vm6 = vcmp.ge.f32.partialorder %v396_v34, 0.0 }
  0xcd   : > { %v2334_v39 = vpack.c.bf16 %v757_v38, %v756_v37 }
  0xcf   : > { %2417 = vst [vmem:[#allocation3 + $0x10] sm:$0xff] %v2334_v39   ;;  %v398_v39 = vpop.f32.mrf.mxu0 }
  0xd1   : > { %v527_v41 = vpop.f32.mrf.mxu1 }
  0xd2   : > { %v726_v42 = vmul.f32 0.01, %v527_v41  ;;  %vm694_vm7 = vcmp.ge.f32.partialorder %v527_v41, 0.0 }
  0xd4   : > { %2045 = vmatmul.msk.bf16.gmra.mxu1 %vm333_vm0, %v2871_v40  ;;  %v758_v45 = vsel %vm694_vm7, %v527_v41, %v726_v42  ;;  %v658_v42 = vsel %vm594_vm6, %v396_v34, %v626_v36 }
  0xd5   : > { %2013 = vmatmul.msk.bf16.gmra.mxu0 %vm333_vm0, %v2871_v40  ;;  %v2208_v40 = vld [vmem:[#allocation3 + $0x28] sm:$0xff] }
  0xd6   : > { %v2210_v32 = vld [vmem:[#allocation3 + $0x10] sm:$0xff] }
  0xd9   : > { %v529_v43 = vpop.f32.mrf.mxu1 }
  0xda   : > { %vm695_vm8 = vcmp.ge.f32.partialorder %v529_v43, 0.0  ;;  %v727_v44 = vmul.f32 0.01, %v529_v43 }
  0xdc   : > { %v759_v46 = vsel %vm695_vm8, %v529_v43, %v727_v44  ;;  %vm595_vm8 = vcmp.ge.f32.partialorder %v398_v39, 0.0  ;;  %v627_v43 = vmul.f32 0.01, %v398_v39 }
  0xdd   : > { %v2339_v47 = vpack.c.bf16 %v759_v46, %v758_v45 }
  0xde   : > { %v659_v45 = vsel %vm595_vm8, %v398_v39, %v627_v43 }
  0xdf   : > { %2418 = vst [vmem:[#allocation3 + $0x40] sm:$0xff] %v2339_v47  }
  0xe1   : > { %v532_v49 = vpop.f32.mrf.mxu1 }
  0xe2   : > { %v728_v50 = vmul.f32 0.01, %v532_v49  ;;  %vm696_vm9 = vcmp.ge.f32.partialorder %v532_v49, 0.0 }
  0xe4   : > { %2046 = vmatmul.msk.bf16.gmra.mxu1 %vm333_vm0, %v2877_v48  ;;  %v760_v53 = vsel %vm696_vm9, %v532_v49, %v728_v50  ;;  %v2249_v49 = vpack.c.bf16 %v659_v45, %v658_v42 }
  0xe5   : > { %2014 = vmatmul.msk.bf16.gmra.mxu0 %vm333_vm0, %v2877_v48 }
  0xe6   : > { %2401 = vst [vmem:[#allocation2] sm:$0xff] %v2249_v49  }
  0xe9   : > { %v534_v51 = vpop.f32.mrf.mxu1 }
  0xea   : > { %vm697_vm10 = vcmp.ge.f32.partialorder %v534_v51, 0.0  ;;  %v729_v52 = vmul.f32 0.01, %v534_v51 }
  0xec   : > { %v761_v54 = vsel %vm697_vm10, %v534_v51, %v729_v52  ;;  %v401_v51 = vpop.f32.mrf.mxu0 }
  0xed   : > { %v2344_v55 = vpack.c.bf16 %v761_v54, %v760_v53  ;;  %v628_v53 = vmul.f32 0.01, %v401_v51  ;;  %v2211_v54 = vld [vmem:[#allocation3 + $0x40] sm:$0xff]  ;;  %vm596_vm10 = vcmp.ge.f32.partialorder %v401_v51, 0.0 }
  0xef   : > { %2419 = vst [vmem:[#allocation3 + $0x48] sm:$0xff] %v2344_v55  }
  0xf1   : > { %v537_v57 = vpop.f32.mrf.mxu1 }
  0xf2   : > { %v730_v58 = vmul.f32 0.01, %v537_v57  ;;  %vm698_vm11 = vcmp.ge.f32.partialorder %v537_v57, 0.0 }
  0xf4   : > { %2047 = vmatmul.msk.bf16.gmra.mxu1 %vm333_vm0, %v2884_v56  ;;  %v762_v61 = vsel %vm698_vm11, %v537_v57, %v730_v58  ;;  %v403_v57 = vpop.f32.mrf.mxu0 }
  0xf5   : > { %2015 = vmatmul.msk.bf16.gmra.mxu0 %vm333_vm0, %v2884_v56 }
  0xf6   : > { %v2212_v24 = vld [vmem:[#allocation3 + $0x48] sm:$0xff] }
  0xf9   : > { %v539_v59 = vpop.f32.mrf.mxu1 }
  0xfa   : > { %vm699_vm12 = vcmp.ge.f32.partialorder %v539_v59, 0.0  ;;  %v731_v60 = vmul.f32 0.01, %v539_v59 }
  0xfc   : > { %v763_v62 = vsel %vm699_vm12, %v539_v59, %v731_v60  ;;  %v660_v59 = vsel %vm596_vm10, %v401_v51, %v628_v53  ;;  %vm597_vm12 = vcmp.ge.f32.partialorder %v403_v57, 0.0  ;;  %v629_v60 = vmul.f32 0.01, %v403_v57 }
  0xfd   : > { %v2349_v63 = vpack.c.bf16 %v763_v62, %v762_v61 }
  0xfe   : > { %v661_v62 = vsel %vm597_vm12, %v403_v57, %v629_v60 }
  0xff   : > { %2420 = vst [vmem:[#allocation3 + $0x30] sm:$0xff] %v2349_v63  }
 0x101   : > { %v542_v1 = vpop.f32.mrf.mxu1 }
 0x102   : > { %v732_v2 = vmul.f32 0.01, %v542_v1  ;;  %vm700_vm13 = vcmp.ge.f32.partialorder %v542_v1, 0.0 }
 0x104   : > { %2048 = vmatmul.msk.bf16.gmra.mxu1 %vm333_vm0, %v2891_v0  ;;  %v764_v5 = vsel %vm700_vm13, %v542_v1, %v732_v2  ;;  %v2254_v2 = vpack.c.bf16 %v661_v62, %v660_v59 }
 0x105   : > { %2016 = vmatmul.msk.bf16.gmra.mxu0 %vm333_vm0, %v2891_v0 }
 0x106   : > { %v2213_v37 = vld [vmem:[#allocation3 + $0x30] sm:$0xff]  ;;  %2402 = vst [vmem:[#allocation2 + $0x58] sm:$0xff] %v2254_v2  }
 0x109   : > { %v544_v3 = vpop.f32.mrf.mxu1 }
 0x10a   : > { %vm701_vm14 = vcmp.ge.f32.partialorder %v544_v3, 0.0  ;;  %v733_v4 = vmul.f32 0.01, %v544_v3 }
 0x10c   : > { %v765_v6 = vsel %vm701_vm14, %v544_v3, %v733_v4  ;;  %v406_v4 = vpop.f32.mrf.mxu0 }
 0x10d   : > { %v2354_v7 = vpack.c.bf16 %v765_v6, %v764_v5  ;;  %v630_v6 = vmul.f32 0.01, %v406_v4  ;;  %vm598_vm14 = vcmp.ge.f32.partialorder %v406_v4, 0.0 }
 0x10f   : > { %2421 = vst [vmem:[#allocation3 + $0x70] sm:$0xff] %v2354_v7   ;;  %v2209_v7 = vld [vmem:[#allocation3 + $0x68] sm:$0xff] }
 0x111   : > { %v547_v9 = vpop.f32.mrf.mxu1 }
 0x112   : > { %v734_v10 = vmul.f32 0.01, %v547_v9  ;;  %vm702_vm15 = vcmp.ge.f32.partialorder %v547_v9, 0.0 }
 0x114   : > { %2049 = vmatmul.msk.bf16.gmra.mxu1 %vm333_vm0, %v2898_v8  ;;  %v766_v14 = vsel %vm702_vm15, %v547_v9, %v734_v10  ;;  %v408_v10 = vpop.f32.mrf.mxu0 }
 0x115   : > { %2017 = vmatmul.msk.bf16.gmra.mxu0 %vm333_vm0, %v2898_v8 }
 0x116   : > { %v2214_v16 = vld [vmem:[#allocation3 + $0x70] sm:$0xff] }
 0x119   : > { %v549_v12 = vpop.f32.mrf.mxu1 }
 0x11a   : > { %vm703_vm1 = vcmp.ge.f32.partialorder %v549_v12, 0.0  ;;  %v735_v13 = vmul.f32 0.01, %v549_v12 }
 0x11c   : > { %v767_v15 = vsel %vm703_vm1, %v549_v12, %v735_v13  ;;  %v662_v13 = vsel %vm598_vm14, %v406_v4, %v630_v6  ;;  %vm599_vm1 = vcmp.ge.f32.partialorder %v408_v10, 0.0 }
 0x11d   : > { %v2359_v17 = vpack.c.bf16 %v767_v15, %v766_v14  ;;  %v631_v14 = vmul.f32 0.01, %v408_v10 }
 0x11f   : > { %2422 = vst [vmem:[#allocation3 + $0x38] sm:$0xff] %v2359_v17   ;;  %v663_v17 = vsel %vm599_vm1, %v408_v10, %v631_v14 }
 0x120   : > { %v2259_v20 = vpack.c.bf16 %v663_v17, %v662_v13 }
 0x121   : > { %v552_v19 = vpop.f32.mrf.mxu1 }
 0x122   : > { %v736_v11 = vmul.f32 0.01, %v552_v19  ;;  %vm704_vm3 = vcmp.ge.f32.partialorder %v552_v19, 0.0  ;;  %2403 = vst [vmem:[#allocation2 + $0x18] sm:$0xff] %v2259_v20   ;;  %v2932_v20 = vld [vmem:[#allocation2 + $0x30] sm:$0xff] }
 0x124   : > { %v768_v29 = vsel %vm704_vm3, %v552_v19, %v736_v11  ;;  %v411_v11 = vpop.f32.mrf.mxu0 }
 0x125   : > { %v632_v25 = vmul.f32 0.01, %v411_v11  ;;  %vm600_vm3 = vcmp.ge.f32.partialorder %v411_v11, 0.0 }
 0x126   : > { %v2215_v21 = vld [vmem:[#allocation3 + $0x38] sm:$0xff] }
 0x127   : > { %1173 = vmatpush.bf16.xpose.msrb.mxu0 %v2215_v21  ;;  %2431 = vmatpush.bf16.xpose.msra.mxu2 %v2215_v21 }
 0x129   : > { %v554_v23 = vpop.f32.mrf.mxu1  ;;  %v2922_v53 = vld [vmem:[#allocation2 + $0x18] sm:$0xff] }
 0x12a   : > { %vm705_vm5 = vcmp.ge.f32.partialorder %v554_v23, 0.0  ;;  %v737_v27 = vmul.f32 0.01, %v554_v23 }
 0x12c   : > { %v769_v30 = vsel %vm705_vm5, %v554_v23, %v737_v27  ;;  %v2912_v23 = vld [vmem:[#allocation2] sm:$0xff]  ;;  %v413_v27 = vpop.f32.mrf.mxu0 }
 0x12d   : > { %v2364_v33 = vpack.c.bf16 %v769_v30, %v768_v29  ;;  %v664_v29 = vsel %vm600_vm3, %v411_v11, %v632_v25  ;;  %vm601_vm5 = vcmp.ge.f32.partialorder %v413_v27, 0.0  ;;  %v633_v30 = vmul.f32 0.01, %v413_v27 }
 0x12f   : > { %2423 = vst [vmem:[#allocation3 + $0x20] sm:$0xff] %v2364_v33   ;;  %1174 = vmatpush.bf16.xpose.msrb.mxu0 %v2214_v16  ;;  %2432 = vmatpush.bf16.xpose.msra.mxu2 %v2214_v16  ;;  %v665_v33 = vsel %vm601_vm5, %v413_v27, %v633_v30 }
 0x131   : > { %v557_v35 = vpop.f32.mrf.mxu1 }
 0x132   : > { %v738_v38 = vmul.f32 0.01, %v557_v35  ;;  %vm706_vm7 = vcmp.ge.f32.partialorder %v557_v35, 0.0 }
 0x134   : > { %v770_v46 = vsel %vm706_vm7, %v557_v35, %v738_v38  ;;  %v2264_v35 = vpack.c.bf16 %v665_v33, %v664_v29  ;;  %v416_v48 = vpop.f32.mrf.mxu0  ;;  %v2917_v38 = vld [vmem:[#allocation2 + $0x58] sm:$0xff] }
 0x135   : > { %v634_v39 = vmul.f32 0.01, %v416_v48  ;;  %vm602_vm7 = vcmp.ge.f32.partialorder %v416_v48, 0.0 }
 0x136   : > { %2404 = vst [vmem:[#allocation2 + $0x50] sm:$0xff] %v2264_v35  }
 0x137   : > { %1175 = vmatpush.bf16.xpose.msrb.mxu0 %v2213_v37  ;;  %2433 = vmatpush.bf16.xpose.msra.mxu2 %v2213_v37 }
 0x139   : > { %v559_v41 = vpop.f32.mrf.mxu1 }
 0x13a   : > { %vm707_vm9 = vcmp.ge.f32.partialorder %v559_v41, 0.0  ;;  %v739_v44 = vmul.f32 0.01, %v559_v41 }
 0x13c   : > { %v771_v47 = vsel %vm707_vm9, %v559_v41, %v739_v44  ;;  %v418_v42 = vpop.f32.mrf.mxu0  ;;  %v666_v44 = vsel %vm602_vm7, %v416_v48, %v634_v39 }
 0x13d   : > { %v2369_v50 = vpack.c.bf16 %v771_v47, %v770_v46  ;;  %vm603_vm9 = vcmp.ge.f32.partialorder %v418_v42, 0.0  ;;  %v635_v45 = vmul.f32 0.01, %v418_v42  ;;  %v2927_v4 = vld [vmem:[#allocation2 + $0x50] sm:$0xff] }
 0x13f   : > { %2424 = vst [vmem:[#allocation3 + $0x78] sm:$0xff] %v2369_v50   ;;  %1176 = vmatpush.bf16.xpose.msrb.mxu0 %v2212_v24  ;;  %2434 = vmatpush.bf16.xpose.msra.mxu2 %v2212_v24  ;;  %v667_v47 = vsel %vm603_vm9, %v418_v42, %v635_v45 }
 0x140   : > { %v2269_v24 = vpack.c.bf16 %v667_v47, %v666_v44 }
 0x141   : > { %v562_v52 = vpop.f32.mrf.mxu1 }
 0x142   : > { %v740_v55 = vmul.f32 0.01, %v562_v52  ;;  %vm708_vm11 = vcmp.ge.f32.partialorder %v562_v52, 0.0  ;;  %2405 = vst [vmem:[#allocation2 + $0x68] sm:$0xff] %v2269_v24  }
 0x144   : > { %v772_v63 = vsel %vm708_vm11, %v562_v52, %v740_v55  ;;  %v421_v56 = vpop.f32.mrf.mxu0 }
 0x145   : > { %vm604_vm11 = vcmp.ge.f32.partialorder %v421_v56, 0.0 }
 0x147   : > { %1177 = vmatpush.bf16.xpose.msrb.mxu0 %v2211_v54  ;;  %2435 = vmatpush.bf16.xpose.msra.mxu2 %v2211_v54  ;;  %v636_v54 = vmul.f32 0.01, %v421_v56 }
 0x149   : > { %v564_v58 = vpop.f32.mrf.mxu1  ;;  %v668_v59 = vsel %vm604_vm11, %v421_v56, %v636_v54  ;;  %v2217_v54 = vld [vmem:[#allocation3 + $0x78] sm:$0xff] }
 0x14a   : > { %vm709_vm13 = vcmp.ge.f32.partialorder %v564_v58, 0.0  ;;  %v741_v61 = vmul.f32 0.01, %v564_v58 }
 0x14c   : > { %v773_v1 = vsel %vm709_vm13, %v564_v58, %v741_v61  ;;  %v423_v57 = vpop.f32.mrf.mxu0 }
 0x14d   : > { %v2374_v3 = vpack.c.bf16 %v773_v1, %v772_v63  ;;  %vm605_vm13 = vcmp.ge.f32.partialorder %v423_v57, 0.0  ;;  %v637_v60 = vmul.f32 0.01, %v423_v57 }
 0x14f   : > { %2425 = vst [vmem:[#allocation3 + $0x18] sm:$0xff] %v2374_v3   ;;  %1178 = vmatpush.bf16.xpose.msrb.mxu0 %v2210_v32  ;;  %2436 = vmatpush.bf16.xpose.msra.mxu2 %v2210_v32  ;;  %v669_v62 = vsel %vm605_vm13, %v423_v57, %v637_v60 }
 0x150   : > { %v2274_v2 = vpack.c.bf16 %v669_v62, %v668_v59 }
 0x151   : > { %v567_v5 = vpop.f32.mrf.mxu1 }
 0x152   : > { %v742_v9 = vmul.f32 0.01, %v567_v5  ;;  %vm710_vm15 = vcmp.ge.f32.partialorder %v567_v5, 0.0  ;;  %2406 = vst [vmem:[#allocation2 + $0x8] sm:$0xff] %v2274_v2  }
 0x154   : > { %v774_v18 = vsel %vm710_vm15, %v567_v5, %v742_v9  ;;  %v426_v0 = vpop.f32.mrf.mxu0 }
 0x155   : > { %v638_v5 = vmul.f32 0.01, %v426_v0  ;;  %vm606_vm15 = vcmp.ge.f32.partialorder %v426_v0, 0.0 }
 0x156   : > { %v2218_v24 = vld [vmem:[#allocation3 + $0x18] sm:$0xff] }
 0x157   : > { %1179 = vmatpush.bf16.xpose.msrb.mxu0 %v2209_v7  ;;  %2437 = vmatpush.bf16.xpose.msra.mxu2 %v2209_v7  ;;  %v670_v10 = vsel %vm606_vm15, %v426_v0, %v638_v5 }
 0x159   : > { %v569_v12 = vpop.f32.mrf.mxu1 }
 0x15a   : > { %vm711_vm2 = vcmp.ge.f32.partialorder %v569_v12, 0.0  ;;  %v743_v15 = vmul.f32 0.01, %v569_v12 }
 0x15c   : > { %v775_v19 = vsel %vm711_vm2, %v569_v12, %v743_v15  ;;  %v428_v7 = vpop.f32.mrf.mxu0 }
 0x15d   : > { %v2379_v21 = vpack.c.bf16 %v775_v19, %v774_v18  ;;  %vm607_vm2 = vcmp.ge.f32.partialorder %v428_v7, 0.0  ;;  %v639_v12 = vmul.f32 0.01, %v428_v7 }
 0x15f   : > { %2426 = vst [vmem:[#allocation3 + $0x58] sm:$0xff] %v2379_v21   ;;  %1180 = vmatpush.bf16.xpose.msrb.mxu0 %v2208_v40  ;;  %2438 = vmatpush.bf16.xpose.msra.mxu2 %v2208_v40  ;;  %v671_v14 = vsel %vm607_vm2, %v428_v7, %v639_v12  ;;  %v2934_v21 = vld [vmem:[#allocation2 + $0x68] sm:$0xff] }
 0x160   : > { %v2279_v18 = vpack.c.bf16 %v671_v14, %v670_v10 }
 0x161   : > { %v572_v22 = vpop.f32.mrf.mxu1 }
 0x162   : > { %v744_v26 = vmul.f32 0.01, %v572_v22  ;;  %vm712_vm4 = vcmp.ge.f32.partialorder %v572_v22, 0.0  ;;  %2407 = vst [vmem:[#allocation2 + $0x48] sm:$0xff] %v2279_v18  }
 0x164   : > { %v776_v16 = vsel %vm712_vm4, %v572_v22, %v744_v26  ;;  %v431_v8 = vpop.f32.mrf.mxu0 }
 0x165   : > { %v640_v40 = vmul.f32 0.01, %v431_v8  ;;  %vm608_vm0 = vcmp.ge.f32.partialorder %v431_v8, 0.0 }
 0x166   : > { %1186 = vmatmul.bf16.vlgmr.msra.gmra.mxu2 %v2912_v23  ;;  %1181 = vmatmul.bf16.vlgmr.msrb.gmra.mxu0 %v2932_v20  ;;  %v2219_v44 = vld [vmem:[#allocation3 + $0x58] sm:$0xff] }
 0x167   : > { %v672_v25 = vsel %vm608_vm0, %v431_v8, %v640_v40 }
 0x169   : > { %v574_v28 = vpop.f32.mrf.mxu1  ;;  %v2941_v42 = vld [vmem:[#allocation2 + $0x48] sm:$0xff] }
 0x16a   : > { %vm713_vm6 = vcmp.ge.f32.partialorder %v574_v28, 0.0  ;;  %v745_v31 = vmul.f32 0.01, %v574_v28 }
 0x16c   : > { %v777_v34 = vsel %vm713_vm6, %v574_v28, %v745_v31  ;;  %v433_v22 = vpop.f32.mrf.mxu0  ;;  %v2938_v31 = vld [vmem:[#allocation2 + $0x8] sm:$0xff] }
 0x16d   : > { %v2384_v36 = vpack.c.bf16 %v777_v34, %v776_v16  ;;  %vm609_vm4 = vcmp.ge.f32.partialorder %v433_v22, 0.0  ;;  %v641_v26 = vmul.f32 0.01, %v433_v22 }
 0x16f   : > { %2427 = vst [vmem:[#allocation3] sm:$0xff] %v2384_v36   ;;  %v673_v27 = vsel %vm609_vm4, %v433_v22, %v641_v26 }
 0x170   : > { %v2284_v28 = vpack.c.bf16 %v673_v27, %v672_v25 }
 0x171   : > { %v577_v37 = vpop.f32.mrf.mxu1 }
 0x172   : > { %v746_v41 = vmul.f32 0.01, %v577_v37  ;;  %vm714_vm8 = vcmp.ge.f32.partialorder %v577_v37, 0.0  ;;  %2408 = vst [vmem:[#allocation2 + $0x40] sm:$0xff] %v2284_v28  }
 0x174   : > { %v778_v49 = vsel %vm714_vm8, %v577_v37, %v746_v41  ;;  %v436_v30 = vpop.f32.mrf.mxu0 }
 0x175   : > { %v642_v33 = vmul.f32 0.01, %v436_v30  ;;  %vm610_vm5 = vcmp.ge.f32.partialorder %v436_v30, 0.0 }
 0x176   : > { %1191 = vmatmul.bf16.gmra.mxu2 %v2917_v38  ;;  %v2220_v39 = vld [vmem:[#allocation3] sm:$0xff] }
 0x177   : > { %v674_v35 = vsel %vm610_vm5, %v436_v30, %v642_v33 }
 0x179   : > { %v579_v43 = vpop.f32.mrf.mxu1  ;;  %v2944_v56 = vld [vmem:[#allocation2 + $0x40] sm:$0xff] }
 0x17a   : > { %vm715_vm10 = vcmp.ge.f32.partialorder %v579_v43, 0.0  ;;  %v747_v46 = vmul.f32 0.01, %v579_v43 }
 0x17c   : > { %v779_v50 = vsel %vm715_vm10, %v579_v43, %v747_v46  ;;  %v438_v34 = vpop.f32.mrf.mxu0 }
 0x17d   : > { %v2389_v51 = vpack.c.bf16 %v779_v50, %v778_v49  ;;  %vm611_vm6 = vcmp.ge.f32.partialorder %v438_v34, 0.0  ;;  %v643_v36 = vmul.f32 0.01, %v438_v34 }
 0x17f   : > { %2428 = vst [vmem:[#allocation3 + $0x8] sm:$0xff] %v2389_v51   ;;  %v675_v48 = vsel %vm611_vm6, %v438_v34, %v643_v36 }
 0x180   : > { %v2289_v37 = vpack.c.bf16 %v675_v48, %v674_v35 }
 0x181   : > { %v582_v52 = vpop.f32.mrf.mxu1 }
 0x182   : > { %v748_v55 = vmul.f32 0.01, %v582_v52  ;;  %vm716_vm12 = vcmp.ge.f32.partialorder %v582_v52, 0.0  ;;  %2409 = vst [vmem:[#allocation2 + $0x20] sm:$0xff] %v2289_v37  }
 0x184   : > { %v780_v63 = vsel %vm716_vm12, %v582_v52, %v748_v55  ;;  %v441_v41 = vpop.f32.mrf.mxu0 }
 0x185   : > { %v644_v43 = vmul.f32 0.01, %v441_v41  ;;  %vm612_vm7 = vcmp.ge.f32.partialorder %v441_v41, 0.0 }
 0x186   : > { %1196 = vmatmul.bf16.gmra.mxu2 %v2922_v53  ;;  %v2221_v16 = vld [vmem:[#allocation3 + $0x8] sm:$0xff] }
 0x187   : > { %v676_v46 = vsel %vm612_vm7, %v441_v41, %v644_v43 }
 0x189   : > { %v584_v58 = vpop.f32.mrf.mxu1 }
 0x18a   : > { %vm717_vm14 = vcmp.ge.f32.partialorder %v584_v58, 0.0  ;;  %v749_v61 = vmul.f32 0.01, %v584_v58 }
 0x18c   : > { %v781_v1 = vsel %vm717_vm14, %v584_v58, %v749_v61  ;;  %v443_v45 = vpop.f32.mrf.mxu0  ;;  %v2216_v61 = vld [vmem:[#allocation3 + $0x20] sm:$0xff] }
 0x18d   : > { %v2394_v3 = vpack.c.bf16 %v781_v1, %v780_v63  ;;  %vm613_vm8 = vcmp.ge.f32.partialorder %v443_v45, 0.0  ;;  %v645_v47 = vmul.f32 0.01, %v443_v45  ;;  %v2947_v63 = vld [vmem:[#allocation2 + $0x20] sm:$0xff] }
 0x18f   : > { %2429 = vst [vmem:[#allocation3 + $0x60] sm:$0xff] %v2394_v3   ;;  %v677_v49 = vsel %vm613_vm8, %v443_v45, %v645_v47 }
 0x190   : > { %v2294_v50 = vpack.c.bf16 %v677_v49, %v676_v46 }
 0x191   : > { %v587_v32 = vpop.f32.mrf.mxu1 }
 0x192   : > { %v750_v6 = vmul.f32 0.01, %v587_v32  ;;  %vm718_vm1 = vcmp.ge.f32.partialorder %v587_v32, 0.0  ;;  %2410 = vst [vmem:[#allocation2 + $0x10] sm:$0xff] %v2294_v50  }
 0x194   : > { %v782_v15 = vsel %vm718_vm1, %v587_v32, %v750_v6  ;;  %v446_v51 = vpop.f32.mrf.mxu0 }
 0x195   : > { %v646_v52 = vmul.f32 0.01, %v446_v51  ;;  %vm614_vm9 = vcmp.ge.f32.partialorder %v446_v51, 0.0 }
 0x196   : > { %1201 = vmatmul.bf16.gmra.mxu2 %v2927_v4  ;;  %v2222_v29 = vld [vmem:[#allocation3 + $0x60] sm:$0xff] }
 0x197   : > { %v678_v57 = vsel %vm614_vm9, %v446_v51, %v646_v52 }
 0x199   : > { %v589_v9 = vpop.f32.mrf.mxu1  ;;  %v2956_v10 = vld [vmem:[#allocation2 + $0x10] sm:$0xff] }
 0x19a   : > { %vm719_vm3 = vcmp.ge.f32.partialorder %v589_v9, 0.0  ;;  %v751_v13 = vmul.f32 0.01, %v589_v9 }
 0x19c   : > { %v783_v17 = vsel %vm719_vm3, %v589_v9, %v751_v13  ;;  %v448_v55 = vpop.f32.mrf.mxu0 }
 0x19d   : > { %v2399_v19 = vpack.c.bf16 %v783_v17, %v782_v15  ;;  %vm615_vm10 = vcmp.ge.f32.partialorder %v448_v55, 0.0  ;;  %v647_v58 = vmul.f32 0.01, %v448_v55 }
 0x19f   : > { %2430 = vst [vmem:[#allocation3 + $0x50] sm:$0xff] %v2399_v19   ;;  %v679_v59 = vsel %vm615_vm10, %v448_v55, %v647_v58 }
 0x1a0   : > { %v2299_v60 = vpack.c.bf16 %v679_v59, %v678_v57 }
 0x1a2   : > { %2411 = vst [vmem:[#allocation2 + $0x38] sm:$0xff] %v2299_v60  }
 0x1a4   : > { %v451_v62 = vpop.f32.mrf.mxu0 }
 0x1a5   : > { %v648_v1 = vmul.f32 0.01, %v451_v62  ;;  %vm616_vm11 = vcmp.ge.f32.partialorder %v451_v62, 0.0 }
 0x1a6   : > { %v2223_v11 = vld [vmem:[#allocation3 + $0x50] sm:$0xff]  ;;  %1206 = vmatmul.bf16.gmra.mxu2 %v2934_v21 }
 0x1a7   : > { %1262 = vmatpush.bf16.xpose.msrb.mxu1 %v2223_v11  ;;  %2439 = vmatpush.bf16.xpose.msra.mxu3 %v2223_v11  ;;  %v680_v3 = vsel %vm616_vm11, %v451_v62, %v648_v1 }
 0x1ac   : > { %v453_v2 = vpop.f32.mrf.mxu0 }
 0x1ad   : > { %vm617_vm12 = vcmp.ge.f32.partialorder %v453_v2, 0.0  ;;  %v649_v0 = vmul.f32 0.01, %v453_v2 }
 0x1af   : > { %1263 = vmatpush.bf16.xpose.msrb.mxu1 %v2222_v29  ;;  %2440 = vmatpush.bf16.xpose.msra.mxu3 %v2222_v29  ;;  %v681_v5 = vsel %vm617_vm12, %v453_v2, %v649_v0 }
 0x1b0   : > { %v2304_v6 = vpack.c.bf16 %v681_v5, %v680_v3 }
 0x1b2   : > { %2412 = vst [vmem:[#allocation2 + $0x60] sm:$0xff] %v2304_v6  }
 0x1b4   : > { %v456_v7 = vpop.f32.mrf.mxu0 }
 0x1b5   : > { %v650_v12 = vmul.f32 0.01, %v456_v7  ;;  %vm618_vm13 = vcmp.ge.f32.partialorder %v456_v7, 0.0 }
 0x1b6   : > { %1211 = vmatmul.bf16.gmra.mxu2 %v2938_v31 }
 0x1b7   : > { %1264 = vmatpush.bf16.xpose.msrb.mxu1 %v2221_v16  ;;  %2441 = vmatpush.bf16.xpose.msra.mxu3 %v2221_v16  ;;  %v682_v13 = vsel %vm618_vm13, %v456_v7, %v650_v12 }
 0x1b9   : > { %v2236_v30 = vld [vmem:[#allocation2 + $0x60] sm:$0xff] }
 0x1bf   : > { %1265 = vmatpush.bf16.xpose.msrb.mxu1 %v2220_v39  ;;  %2442 = vmatpush.bf16.xpose.msra.mxu3 %v2220_v39 }
 0x1c6   : > { %1216 = vmatmul.bf16.gmra.mxu2 %v2941_v42 }
 0x1c7   : > { %1266 = vmatpush.bf16.xpose.msrb.mxu1 %v2219_v44  ;;  %2443 = vmatpush.bf16.xpose.msra.mxu3 %v2219_v44 }
 0x1cf   : > { %1267 = vmatpush.bf16.xpose.msrb.mxu1 %v2218_v24  ;;  %2444 = vmatpush.bf16.xpose.msra.mxu3 %v2218_v24 }
 0x1d6   : > { %1221 = vmatmul.bf16.gmra.mxu2 %v2944_v56 }
 0x1d7   : > { %1268 = vmatpush.bf16.xpose.msrb.mxu1 %v2217_v54  ;;  %2445 = vmatpush.bf16.xpose.msra.mxu3 %v2217_v54 }
 0x1df   : > { %1269 = vmatpush.bf16.xpose.msrb.mxu1 %v2216_v61  ;;  %2446 = vmatpush.bf16.xpose.msra.mxu3 %v2216_v61 }
 0x1e6   : > { %1226 = vmatmul.bf16.gmra.mxu2 %v2947_v63  ;;  %1270 = vmatmul.bf16.vlgmr.msrb.gmra.mxu1 %v2932_v20  ;;  %v2235_v20 = vld [vmem:[#allocation2 + $0x38] sm:$0xff] }
 0x1e7   : > { %1275 = vmatmul.bf16.vlgmr.msra.gmra.mxu3 %v2912_v23  ;;  %v458_v23 = vpop.f32.mrf.mxu0 }
 0x1e8   : > { %vm619_vm14 = vcmp.ge.f32.partialorder %v458_v23, 0.0  ;;  %v651_v14 = vmul.f32 0.01, %v458_v23 }
 0x1e9   : > { %v2952_v32 = vpop.f32.mrf.mxu2 }
 0x1ea   : > { %v683_v17 = vsel %vm619_vm14, %v458_v23, %v651_v14 }
 0x1eb   : > { %v2309_v18 = vpack.c.bf16 %v683_v17, %v682_v13 }
 0x1ed   : > { %2413 = vst [vmem:[#allocation2 + $0x70] sm:$0xff] %v2309_v18  }
 0x1ef   : > { %v461_v19 = vpop.f32.mrf.mxu0 }
 0x1f0   : > { %v652_v40 = vmul.f32 0.01, %v461_v19  ;;  %vm620_vm15 = vcmp.ge.f32.partialorder %v461_v19, 0.0 }
 0x1f1   : > { %v2954_v9 = vpop.f32.mrf.mxu2 }
 0x1f4   : > { %v2237_v39 = vld [vmem:[#allocation2 + $0x70] sm:$0xff] }
 0x1f6   : > { %1231 = vmatmul.bf16.gmra.mxu2 %v2956_v10 }
 0x1f7   : > { %1280 = vmatmul.bf16.gmra.mxu3 %v2917_v38  ;;  %v463_v11 = vpop.f32.mrf.mxu0  ;;  %v684_v38 = vsel %vm620_vm15, %v461_v19, %v652_v40 }
 0x1f8   : > { %vm621_vm1 = vcmp.ge.f32.partialorder %v463_v11, 0.0  ;;  %v653_v22 = vmul.f32 0.01, %v463_v11 }
 0x1f9   : > { %v2960_v15 = vpop.f32.mrf.mxu2 }
 0x1fa   : > { %v685_v26 = vsel %vm621_vm1, %v463_v11, %v653_v22 }
 0x1fb   : > { %v2314_v27 = vpack.c.bf16 %v685_v26, %v684_v38 }
 0x1fd   : > { %2414 = vst [vmem:[#allocation2 + $0x78] sm:$0xff] %v2314_v27  }
 0x1ff   : > { %v466_v28 = vpop.f32.mrf.mxu0 }
 0x200   : > { %v654_v33 = vmul.f32 0.01, %v466_v28  ;;  %vm622_vm2 = vcmp.ge.f32.partialorder %v466_v28, 0.0 }
 0x201   : > { %v2962_v8 = vpop.f32.mrf.mxu2 }
 0x206   : > { %1236 = vmatmul.bf16.gmra.mxu2 %v2235_v20 }
 0x207   : > { %1285 = vmatmul.bf16.gmra.mxu3 %v2922_v53  ;;  %v468_v16 = vpop.f32.mrf.mxu0  ;;  %v686_v53 = vsel %vm622_vm2, %v466_v28, %v654_v33 }
 0x208   : > { %vm623_vm3 = vcmp.ge.f32.partialorder %v468_v16, 0.0  ;;  %v655_v34 = vmul.f32 0.01, %v468_v16 }
 0x209   : > { %v2965_v25 = vpop.f32.mrf.mxu2 }
 0x20a   : > { %v687_v36 = vsel %vm623_vm3, %v468_v16, %v655_v34 }
 0x20b   : > { %v2319_v48 = vpack.c.bf16 %v687_v36, %v686_v53 }
 0x20d   : > { %2415 = vst [vmem:[#allocation2 + $0x28] sm:$0xff] %v2319_v48  }
 0x211   : > { %v2967_v29 = vpop.f32.mrf.mxu2 }
 0x214   : > { %v2239_v46 = vld [vmem:[#allocation2 + $0x28] sm:$0xff] }
 0x216   : > { %1241 = vmatmul.bf16.gmra.mxu2 %v2236_v30 }
 0x217   : > { %1290 = vmatmul.bf16.gmra.mxu3 %v2927_v4  ;;  %v2238_v4 = vld [vmem:[#allocation2 + $0x78] sm:$0xff] }
 0x219   : > { %v2970_v35 = vpop.f32.mrf.mxu2 }
 0x221   : > { %v2972_v37 = vpop.f32.mrf.mxu2 }
 0x226   : > { %1246 = vmatmul.bf16.gmra.mxu2 %v2237_v39 }
 0x227   : > { %1295 = vmatmul.bf16.gmra.mxu3 %v2934_v21 }
 0x229   : > { %v2975_v41 = vpop.f32.mrf.mxu2 }
 0x231   : > { %v2977_v43 = vpop.f32.mrf.mxu2 }
 0x236   : > { %1251 = vmatmul.bf16.gmra.mxu2 %v2238_v4 }
 0x237   : > { %1300 = vmatmul.bf16.gmra.mxu3 %v2938_v31 }
 0x239   : > { %v2980_v44 = vpop.f32.mrf.mxu2 }
 0x241   : > { %v2982_v45 = vpop.f32.mrf.mxu2 }
 0x246   : > { %1256 = vmatmul.bf16.gmra.mxu2 %v2239_v46 }
 0x247   : > { %1305 = vmatmul.bf16.gmra.mxu3 %v2941_v42 }
 0x249   : > { %v2985_v47 = vpop.f32.mrf.mxu2 }
 0x251   : > { %v2987_v49 = vpop.f32.mrf.mxu2 }
 0x257   : > { %1310 = vmatmul.bf16.gmra.mxu3 %v2944_v56 }
 0x259   : > { %v2990_v21 = vpop.f32.mrf.mxu2 }
 0x261   : > { %v2992_v50 = vpop.f32.mrf.mxu2 }
 0x267   : > { %1315 = vmatmul.bf16.gmra.mxu3 %v2947_v63  ;;  %v1182_v63 = vpop.f32.mrf.mxu0 }
 0x268   : > { %v1351_v5 = vmax.f32 %v1182_v63, %v2952_v32 }
 0x269   : > { %v2995_v31 = vpop.f32.mrf.mxu2 }
 0x26a   : > { %v2997_v24 = vpop.f32.mrf.mxu3 }
 0x26b   : > { %3625 = vst [vmem:[#allocation7_spill] sm:$0xff] %v2997_v24 }
 0x26f   : > { %v1184_v3 = vpop.f32.mrf.mxu0 }
 0x270   : > { %v1352_v6 = vmax.f32 %v1184_v3, %v2954_v9 }
 0x271   : > { %v2999_v51 = vpop.f32.mrf.mxu2 }
 0x272   : > { %v3001_v52 = vpop.f32.mrf.mxu3  ;;  %v1354_v12 = vmax.f32 %v1352_v6, %v2962_v8 }
 0x273   : > { %3626 = vst [vmem:[#allocation8_spill] sm:$0xff] %v3001_v52 }
 0x274   : > { %v1356_v14 = vmax.f32 %v1354_v12, %v2967_v29 }
 0x276   : > { %v1358_v18 = vmax.f32 %v1356_v14, %v2972_v37 }
 0x277   : > { %1320 = vmatmul.bf16.gmra.mxu3 %v2956_v10  ;;  %v1353_v10 = vmax.f32 %v1351_v5, %v2960_v15 }
 0x278   : > { %v1360_v11 = vmax.f32 %v1358_v18, %v2977_v43 }
 0x279   : > { %v3004_v42 = vpop.f32.mrf.mxu2  ;;  %v1355_v13 = vmax.f32 %v1353_v10, %v2965_v25 }
 0x27a   : > { %v3006_v54 = vpop.f32.mrf.mxu3  ;;  %v1362_v26 = vmax.f32 %v1360_v11, %v2982_v45 }
 0x27b   : > { %3627 = vst [vmem:[#allocation9_spill] sm:$0xff] %v3006_v54  ;;  %v1357_v19 = vmax.f32 %v1355_v13, %v2970_v35 }
 0x27d   : > { %v1359_v40 = vmax.f32 %v1357_v19, %v2975_v41 }
 0x27f   : > { %v1361_v22 = vmax.f32 %v1359_v40, %v2980_v44 }
 0x281   : > { %v3008_v56 = vpop.f32.mrf.mxu2  ;;  %v1363_v28 = vmax.f32 %v1361_v22, %v2985_v47 }
 0x282   : > { %v3010_v55 = vpop.f32.mrf.mxu3 }
 0x283   : > { %v1365_v16 = vmax.f32 %v1363_v28, %v2990_v21 }
 0x285   : > { %v1367_v34 = vmax.f32 %v1365_v16, %v2995_v31 }
 0x287   : > { %1325 = vmatmul.bf16.gmra.mxu3 %v2235_v20  ;;  %v1369_v48 = vmax.f32 %v1367_v34, %v3004_v42 }
 0x289   : > { %v3012_v57 = vpop.f32.mrf.mxu2 }
 0x28a   : > { %v3014_v58 = vpop.f32.mrf.mxu3  ;;  %v1371_v5 = vmax.f32 %v1369_v48, %v3012_v57 }
 0x291   : > { %v3016_v59 = vpop.f32.mrf.mxu2 }
 0x292   : > { %v3018_v60 = vpop.f32.mrf.mxu3 }
 0x297   : > { %1330 = vmatmul.bf16.gmra.mxu3 %v2236_v30  ;;  %v1364_v30 = vmax.f32 %v1362_v26, %v2987_v49 }
 0x299   : > { %v3020_v61 = vpop.f32.mrf.mxu2  ;;  %v1366_v53 = vmax.f32 %v1364_v30, %v2992_v50 }
 0x29a   : > { %v3022_v62 = vpop.f32.mrf.mxu3  ;;  %v1373_v10 = vmax.f32 %v1371_v5, %v3020_v61 }
 0x29b   : > { %v1368_v36 = vmax.f32 %v1366_v53, %v2999_v51 }
 0x2a1   : > { %v3024_v1 = vpop.f32.mrf.mxu2 }
 0x2a2   : > { %v3026_v2 = vpop.f32.mrf.mxu3 }
 0x2a7   : > { %1335 = vmatmul.bf16.gmra.mxu3 %v2237_v39  ;;  %v1370_v39 = vmax.f32 %v1368_v36, %v3008_v56 }
 0x2a9   : > { %v3028_v0 = vpop.f32.mrf.mxu2  ;;  %v1372_v6 = vmax.f32 %v1370_v39, %v3016_v59 }
 0x2aa   : > { %v3032_v7 = vpop.f32.mrf.mxu3  ;;  %v1375_v14 = vmax.f32 %v1373_v10, %v3028_v0 }
 0x2ab   : > { %v1374_v12 = vmax.f32 %v1372_v6, %v3024_v1 }
 0x2b1   : > { %v3036_v23 = vpop.f32.mrf.mxu2 }
 0x2b2   : > { %v3040_v17 = vpop.f32.mrf.mxu3 }
 0x2b7   : > { %1340 = vmatmul.bf16.gmra.mxu3 %v2238_v4 }
 0x2b9   : > { %v3044_v20 = vpop.f32.mrf.mxu2 }
 0x2ba   : > { %v3048_v38 = vpop.f32.mrf.mxu3  ;;  %v1377_v18 = vmax.f32 %v1375_v14, %v3044_v20 }
 0x2c1   : > { %v3052_v27 = vpop.f32.mrf.mxu2 }
 0x2c2   : > { %v3056_v33 = vpop.f32.mrf.mxu3 }
 0x2c7   : > { %1345 = vmatmul.bf16.gmra.mxu3 %v2239_v46  ;;  %v1376_v46 = vmax.f32 %v1374_v12, %v3036_v23 }
 0x2c9   : > { %v3064_v4 = vpop.f32.mrf.mxu2  ;;  %v1378_v19 = vmax.f32 %v1376_v46, %v3052_v27 }
 0x2ca   : > { %v3070_v13 = vpop.f32.mrf.mxu3  ;;  %v1379_v11 = vmax.f32 %v1377_v18, %v3064_v4 }
 0x2d1   : > { %v3076_v40 = vpop.f32.mrf.mxu2 }
 0x2d2   : > { %v1380_v22 = vmax.f32 %v1378_v19, %v3076_v40  ;;  %v3080_v30 = vpop.f32.mrf.mxu3 }
 0x2d4   : > { %v1381_v26 = vmax.f32 %v1379_v11, %v1380_v22 }
 0x2d6   : > { %v1382_v28 = vrot.slane %v1381_v26, 4 }
 0x2d8   : > { %v1383_v16 = vmax.f32 %v1381_v26, %v1382_v28 }
 0x2da   : > { %v1384_v53 = vrot.slane %v1383_v16, 2  ;;  %v3082_v48 = vpop.f32.mrf.mxu3 }
 0x2dc   : > { %v1385_v34 = vmax.f32 %v1383_v16, %v1384_v53 }
 0x2de   : > { %v1386_v36 = vrot.slane %v1385_v34, 1 }
 0x2e0   : > { %v3084_v39 = vmax.f32 %v1385_v34, %v1386_v36 }
 0x2e2   : > { %v1425_v5 = vsub.f32 %v1182_v63, %v3084_v39  ;;  %v1427_v6 = vsub.f32 %v1184_v3, %v3084_v39  ;;  %v1429_v10 = vsub.f32 %v2952_v32, %v3084_v39  ;;  %v3090_v12 = vpop.f32.mrf.mxu3  ;;  %v1431_v14 = vsub.f32 %v2954_v9, %v3084_v39 }
 0x2e3   : > { %v1433_v19 = vsub.f32 %v2960_v15, %v3084_v39  ;;  %v1435_v63 = vsub.f32 %v2962_v8, %v3084_v39  ;;  %v1437_v32 = vsub.f32 %v2965_v25, %v3084_v39  ;;  %v1439_v9 = vsub.f32 %v2967_v29, %v3084_v39 }
 0x2e4   : > { %v1489_v46 = vmul.f32 1.442695, %v1425_v5  ;;  %v1493_v18 = vmul.f32 1.442695, %v1427_v6  ;;  %v1497_v11 = vmul.f32 1.442695, %v1429_v10  ;;  %v1441_v8 = vsub.f32 %v2970_v35, %v3084_v39 }
 0x2e5   : > { %v1501_v3 = vmul.f32 1.442695, %v1431_v14  ;;  %v1505_v22 = vmul.f32 1.442695, %v1433_v19  ;;  %v1509_v28 = vmul.f32 1.442695, %v1435_v63  ;;  %v1443_v36 = vsub.f32 %v2972_v37, %v3084_v39 }
 0x2e6   : > { %2504 = vpow2.f32 %v1489_v46  ;;  %v1513_v53 = vmul.f32 1.442695, %v1437_v32  ;;  %v1517_v29 = vmul.f32 1.442695, %v1439_v9  ;;  %v1445_v10 = vsub.f32 %v2975_v41, %v3084_v39 }
 0x2e7   : > { %2506 = vpow2.f32 %v1493_v18  ;;  %v1521_v35 = vmul.f32 1.442695, %v1441_v8  ;;  %v1447_v37 = vsub.f32 %v2977_v43, %v3084_v39  ;;  %v1525_v19 = vmul.f32 1.442695, %v1443_v36 }
 0x2e8   : > { %2508 = vpow2.f32 %v1497_v11  ;;  %v1449_v41 = vsub.f32 %v2980_v44, %v3084_v39  ;;  %v1451_v9 = vsub.f32 %v2982_v45, %v3084_v39  ;;  %v1455_v45 = vsub.f32 %v2987_v49, %v3084_v39 }
 0x2e9   : > { %2510 = vpow2.f32 %v1501_v3  ;;  %v1529_v3 = vmul.f32 1.442695, %v1445_v10  ;;  %v1533_v43 = vmul.f32 1.442695, %v1447_v37 }
 0x2ea   : > { %v3100_v26 = vpop.f32.mrf.mxu3  ;;  %2512 = vpow2.f32 %v1505_v22  ;;  %v1537_v44 = vmul.f32 1.442695, %v1449_v41  ;;  %v1549_v49 = vmul.f32 1.442695, %v1455_v45 }
 0x2eb   : > { %2514 = vpow2.f32 %v1509_v28 }
 0x2ec   : > { %v3104_v15 = vpop.eup %2504  ;;  %2516 = vpow2.f32 %v1513_v53  ;;  %v1453_v53 = vsub.f32 %v2985_v47, %v3084_v39  ;;  %v1457_v47 = vsub.f32 %v2990_v21, %v3084_v39 }
 0x2ed   : > { %v3106_v16 = vpop.eup %2506  ;;  %2518 = vpow2.f32 %v1517_v29 }
 0x2ee   : > { %v1617_v25 = vadd.f32 %v3106_v16, %v3104_v15  ;;  %v3112_v34 = vpop.eup %2508  ;;  %2520 = vpow2.f32 %v1521_v35  ;;  %v1553_v21 = vmul.f32 1.442695, %v1457_v47  ;;  %v1467_v47 = vsub.f32 %v3008_v56, %v3084_v39 }
 0x2ef   : > { %v3117_v6 = vpop.eup %2510  ;;  %2522 = vpow2.f32 %v1525_v19  ;;  %v1471_v56 = vsub.f32 %v3016_v59, %v3084_v39 }
 0x2f0   : > { %v1618_v5 = vadd.f32 %v3112_v34, %v1617_v25  ;;  %v3124_v18 = vpop.eup %2512  ;;  %2524 = vpow2.f32 %v1529_v3 }
 0x2f1   : > { %v3129_v63 = vpop.eup %2514  ;;  %2526 = vpow2.f32 %v1533_v43  ;;  %v1581_v59 = vmul.f32 1.442695, %v1471_v56 }
 0x2f2   : > { %v3121_v14 = vpop.f32.mrf.mxu3  ;;  %v1619_v46 = vadd.f32 %v3117_v6, %v1618_v5  ;;  %v3134_v22 = vpop.eup %2516  ;;  %v1541_v5 = vmul.f32 1.442695, %v1451_v9  ;;  %2528 = vpow2.f32 %v1537_v44 }
 0x2f3   : > { %v3139_v8 = vpop.eup %2518 }
 0x2f4   : > { %v1620_v11 = vadd.f32 %v3124_v18, %v1619_v46  ;;  %v3146_v29 = vpop.eup %2520  ;;  %v1545_v46 = vmul.f32 1.442695, %v1453_v53  ;;  %2530 = vpow2.f32 %v1541_v5 }
 0x2f5   : > { %v3151_v35 = vpop.eup %2522 }
 0x2f6   : > { %v1621_v32 = vadd.f32 %v3129_v63, %v1620_v11  ;;  %v3156_v19 = vpop.eup %2524  ;;  %v1459_v11 = vsub.f32 %v2992_v50, %v3084_v39  ;;  %2532 = vpow2.f32 %v1545_v46  ;;  %v1463_v50 = vsub.f32 %v2999_v51, %v3084_v39 }
 0x2f7   : > { %v3161_v3 = vpop.eup %2526  ;;  %2534 = vpow2.f32 %v1549_v49 }
 0x2f8   : > { %v1622_v28 = vadd.f32 %v3134_v22, %v1621_v32  ;;  %v1461_v32 = vsub.f32 %v2995_v31, %v3084_v39  ;;  %v1557_v53 = vmul.f32 1.442695, %v1459_v11  ;;  %v1465_v31 = vsub.f32 %v3004_v42, %v3084_v39 }
 0x2f9   : > { %2536 = vpow2.f32 %v1553_v21  ;;  %v1565_v51 = vmul.f32 1.442695, %v1463_v50  ;;  %v1469_v11 = vsub.f32 %v3012_v57, %v3084_v39  ;;  %v1573_v21 = vmul.f32 1.442695, %v1467_v47 }
 0x2fa   : > { %v3143_v25 = vpop.f32.mrf.mxu3  ;;  %v1623_v36 = vadd.f32 %v3139_v8, %v1622_v28  ;;  %v3168_v28 = vpop.eup %2528  ;;  %v1561_v45 = vmul.f32 1.442695, %v1461_v32  ;;  %2538 = vpow2.f32 %v1557_v53  ;;  %v1569_v42 = vmul.f32 1.442695, %v1465_v31 }
 0x2fb   : > { %3628 = vst [vmem:[#allocation10_spill] sm:$0xff] %v3143_v25  ;;  %v1473_v57 = vsub.f32 %v3020_v61, %v3084_v39  ;;  %v1577_v53 = vmul.f32 1.442695, %v1469_v11 }
 0x2fc   : > { %v1624_v10 = vadd.f32 %v3146_v29, %v1623_v36  ;;  %v3173_v36 = vpop.eup %2530  ;;  %2540 = vpow2.f32 %v1561_v45  ;;  %v1475_v45 = vsub.f32 %v3024_v1, %v3084_v39  ;;  %v1479_v1 = vsub.f32 %v3036_v23, %v3084_v39 }
 0x2fd   : > { %2542 = vpow2.f32 %v1565_v51  ;;  %v1477_v51 = vsub.f32 %v3028_v0, %v3084_v39  ;;  %v1585_v61 = vmul.f32 1.442695, %v1473_v57  ;;  %v1481_v0 = vsub.f32 %v3044_v20, %v3084_v39 }
 0x2fe   : > { %v1625_v37 = vadd.f32 %v3151_v35, %v1624_v10  ;;  %v3178_v10 = vpop.eup %2532  ;;  %2544 = vpow2.f32 %v1569_v42  ;;  %v1597_v23 = vmul.f32 1.442695, %v1479_v1 }
 0x2ff   : > { %2546 = vpow2.f32 %v1573_v21  ;;  %v1601_v20 = vmul.f32 1.442695, %v1481_v0 }
 0x300   : > { %v1626_v41 = vadd.f32 %v3156_v19, %v1625_v37  ;;  %v3183_v37 = vpop.eup %2534  ;;  %2548 = vpow2.f32 %v1577_v53 }
 0x301   : > { %v3190_v32 = vpop.eup %2536  ;;  %2550 = vpow2.f32 %v1581_v59 }
 0x302   : > { %v3165_v9 = vpop.f32.mrf.mxu3  ;;  %v1627_v43 = vadd.f32 %v3161_v3, %v1626_v41  ;;  %v3195_v50 = vpop.eup %2538  ;;  %2552 = vpow2.f32 %v1585_v61 }
 0x303   : > { %3629 = vst [vmem:[#allocation11_spill] sm:$0xff] %v3165_v9  ;;  %v3200_v31 = vpop.eup %2540 }
 0x304   : > { %v1628_v44 = vadd.f32 %v3168_v28, %v1627_v43  ;;  %v3205_v47 = vpop.eup %2542 }
 0x305   : > { %v3212_v42 = vpop.eup %2544 }
 0x306   : > { %v1629_v5 = vadd.f32 %v3173_v36, %v1628_v44  ;;  %v3217_v21 = vpop.eup %2546 }
 0x307   : > { %v3222_v53 = vpop.eup %2548 }
 0x308   : > { %v1630_v46 = vadd.f32 %v3178_v10, %v1629_v5  ;;  %v3227_v59 = vpop.eup %2550 }
 0x30a   : > { %v3187_v49 = vpop.f32.mrf.mxu3  ;;  %v1631_v41 = vadd.f32 %v3183_v37, %v1630_v46 }
 0x30b   : > { %3630 = vst [vmem:[#allocation12_spill] sm:$0xff] %v3187_v49 }
 0x30c   : > { %v1632_v43 = vadd.f32 %v3190_v32, %v1631_v41  ;;  %v1589_v41 = vmul.f32 1.442695, %v1475_v45 }
 0x30e   : > { %v1633_v44 = vadd.f32 %v3195_v50, %v1632_v43  ;;  %v1593_v43 = vmul.f32 1.442695, %v1477_v51  ;;  %2554 = vpow2.f32 %v1589_v41 }
 0x310   : > { %v1634_v5 = vadd.f32 %v3200_v31, %v1633_v44  ;;  %v1483_v44 = vsub.f32 %v3052_v27, %v3084_v39  ;;  %2556 = vpow2.f32 %v1593_v43  ;;  %v1487_v27 = vsub.f32 %v3076_v40, %v3084_v39 }
 0x311   : > { %2558 = vpow2.f32 %v1597_v23 }
 0x312   : > { %v3209_v46 = vpop.f32.mrf.mxu3  ;;  %v1635_v11 = vadd.f32 %v3205_v47, %v1634_v5  ;;  %v1485_v5 = vsub.f32 %v3064_v4, %v3084_v39  ;;  %v1605_v1 = vmul.f32 1.442695, %v1483_v44  ;;  %2560 = vpow2.f32 %v1601_v20  ;;  %v3255_v20 = vpop.f32.mrf.mxu1 }
 0x313   : > { %3631 = vst [vmem:[#allocation13_spill] sm:$0xff] %v3209_v46  ;;  %v1613_v43 = vmul.f32 1.442695, %v1487_v27 }
 0x314   : > { %v1636_v56 = vadd.f32 %v3212_v42, %v1635_v11  ;;  %v3234_v11 = vpop.eup %2552  ;;  %2562 = vpow2.f32 %v1605_v1  ;;  %3634 = vst [vmem:[#allocation16_spill] sm:$0xff] %v3255_v20 }
 0x316   : > { %v1637_v57 = vadd.f32 %v3217_v21, %v1636_v56  ;;  %v3239_v56 = vpop.eup %2554 }
 0x317   : > { %v3242_v0 = vpop.eup %2556 }
 0x318   : > { %v1638_v45 = vadd.f32 %v3222_v53, %v1637_v57  ;;  %v1609_v57 = vmul.f32 1.442695, %v1485_v5 }
 0x31a   : > { %v3231_v61 = vpop.f32.mrf.mxu3  ;;  %v1639_v51 = vadd.f32 %v3227_v59, %v1638_v45  ;;  %2564 = vpow2.f32 %v1609_v57 }
 0x31b   : > { %3632 = vst [vmem:[#allocation14_spill] sm:$0xff] %v3231_v61  ;;  %v3245_v61 = vpop.eup %2558  ;;  %2566 = vpow2.f32 %v1613_v43  ;;  %v1388_v43 = vmax.f32 %v3255_v20, %v2997_v24 }
 0x31c   : > { %v1640_v41 = vadd.f32 %v3234_v11, %v1639_v51  ;;  %v3250_v44 = vpop.eup %2560 }
 0x31d   : > { %v3253_v5 = vpop.eup %2562  ;;  %v1390_v49 = vmax.f32 %v1388_v43, %v3006_v54 }
 0x31e   : > { %v1641_v4 = vadd.f32 %v3239_v56, %v1640_v41 }
 0x320   : > { %v1642_v45 = vadd.f32 %v3242_v0, %v1641_v4  ;;  %v3258_v27 = vpop.eup %2564 }
 0x321   : > { %v2567_v41 = vpop.eup %2566 }
 0x322   : > { %v3247_v40 = vpop.f32.mrf.mxu3  ;;  %v1643_v39 = vadd.f32 %v3245_v61, %v1642_v45 }
 0x323   : > { %3633 = vst [vmem:[#allocation15_spill] sm:$0xff] %v3247_v40 }
 0x324   : > { %v1644_v23 = vadd.f32 %v3250_v44, %v1643_v39  ;;  %v3265_v39 = vpop.f32.mrf.mxu1 }
 0x325   : > { %v1389_v46 = vmax.f32 %v3265_v39, %v3001_v52 }
 0x326   : > { %v1645_v51 = vadd.f32 %v3253_v5, %v1644_v23 }
 0x328   : > { %v1646_v1 = vadd.f32 %v3258_v27, %v1645_v51  ;;  %v1391_v51 = vmax.f32 %v1389_v46, %v3010_v55 }
 0x32a   : > { %v3261_v57 = vpop.f32.mrf.mxu3  ;;  %v1647_v4 = vadd.f32 %v2567_v41, %v1646_v1 }
 0x32b   : > { %3635 = vst [vmem:[#allocation17_spill] sm:$0xff] %v3261_v57 }
 0x32c   : > { %v1648_v45 = vrot.slane %v1647_v4, 4 }
 0x32e   : > { %v1649_v40 = vadd.f32 %v1648_v45, %v1647_v4  ;;  %v1392_v4 = vmax.f32 %v1390_v49, %v3014_v58  ;;  %v1393_v45 = vmax.f32 %v1391_v51, %v3018_v60 }
 0x330   : > { %v1650_v23 = vrot.slane %v1649_v40, 2  ;;  %v1394_v24 = vmax.f32 %v1392_v4, %v3022_v62  ;;  %v1395_v20 = vmax.f32 %v1393_v45, %v3026_v2 }
 0x332   : > { %v3270_v9 = vpop.f32.mrf.mxu3  ;;  %v1651_v1 = vadd.f32 %v1650_v23, %v1649_v40  ;;  %v1396_v52 = vmax.f32 %v1394_v24, %v3032_v7  ;;  %v1397_v43 = vmax.f32 %v1395_v20, %v3040_v17 }
 0x334   : > { %v1652_v57 = vrot.slane %v1651_v1, 1  ;;  %v1398_v54 = vmax.f32 %v1396_v52, %v3048_v38  ;;  %v1399_v49 = vmax.f32 %v1397_v43, %v3056_v33 }
 0x336   : > { %v1653_v25 = vadd.f32 %v1652_v57, %v1651_v1  ;;  %v1400_v40 = vmax.f32 %v1398_v54, %v3070_v13  ;;  %v1401_v23 = vmax.f32 %v1399_v49, %v3080_v30 }
 0x338   : > { %2568 = vrcp.f32 %v1653_v25  ;;  %v1402_v57 = vmax.f32 %v1400_v40, %v3082_v48  ;;  %v1403_v24 = vmax.f32 %v1401_v23, %v3090_v12 }
 0x33a   : > { %v3281_v46 = vpop.f32.mrf.mxu3  ;;  %v1404_v20 = vmax.f32 %v1402_v57, %v3100_v26  ;;  %v1405_v43 = vmax.f32 %v1403_v24, %v3121_v14  ;;  %v3639_v24 = vld [vmem:[#allocation13_spill] sm:$0xff] }
 0x33e   : > { %v2569_v51 = vpop.eup %2568 }
 0x33f   : > { %v1755_v1 = vmul.f32 %v2569_v51, %v2567_v41  ;;  %v1693_v25 = vmul.f32 %v2569_v51, %v3104_v15  ;;  %v1695_v52 = vmul.f32 %v2569_v51, %v3106_v16  ;;  %v1697_v4 = vmul.f32 %v2569_v51, %v3112_v34 }
 0x340   : > { %v1699_v45 = vmul.f32 %v2569_v51, %v3117_v6  ;;  %v1701_v54 = vmul.f32 %v2569_v51, %v3124_v18  ;;  %v1703_v15 = vmul.f32 %v2569_v51, %v3129_v63  ;;  %v1705_v16 = vmul.f32 %v2569_v51, %v3134_v22 }
 0x341   : > { %1819 = vst [vmem:[%s3297_s5 + $0x1f0] sm:$0xff] %v1755_v1  ;;  %v1707_v41 = vmul.f32 %v2569_v51, %v3139_v8  ;;  %v1709_v34 = vmul.f32 %v2569_v51, %v3146_v29  ;;  %v1715_v18 = vmul.f32 %v2569_v51, %v3161_v3  ;;  %v1717_v49 = vmul.f32 %v2569_v51, %v3168_v28  ;;  %v3641_v1 = vld [vmem:[#allocation15_spill] sm:$0xff] }
 0x342   : > { %v3304_v6 = vpop.f32.mrf.mxu3  ;;  %v1719_v40 = vmul.f32 %v2569_v51, %v3173_v36  ;;  %v1721_v23 = vmul.f32 %v2569_v51, %v3178_v10  ;;  %1757 = vst [vmem:[%s3297_s5] sm:$0xff] %v1693_v25  ;;  %v1723_v63 = vmul.f32 %v2569_v51, %v3183_v37  ;;  %v1725_v22 = vmul.f32 %v2569_v51, %v3190_v32 }
 0x343   : > { %v1727_v8 = vmul.f32 %v2569_v51, %v3195_v50  ;;  %v1729_v29 = vmul.f32 %v2569_v51, %v3200_v31  ;;  %1759 = vst [vmem:[%s3297_s5 + $0x10] sm:$0xff] %v1695_v52  ;;  %v1731_v3 = vmul.f32 %v2569_v51, %v3205_v47  ;;  %v1733_v28 = vmul.f32 %v2569_v51, %v3212_v42  ;;  %v3642_v52 = vld [vmem:[#allocation17_spill] sm:$0xff] }
 0x344   : > { %v1735_v36 = vmul.f32 %v2569_v51, %v3217_v21  ;;  %v1737_v10 = vmul.f32 %v2569_v51, %v3222_v53  ;;  %1761 = vst [vmem:[%s3297_s5 + $0x20] sm:$0xff] %v1697_v4  ;;  %v1739_v37 = vmul.f32 %v2569_v51, %v3227_v59  ;;  %v1741_v32 = vmul.f32 %v2569_v51, %v3234_v11 }
 0x345   : > { %v1743_v50 = vmul.f32 %v2569_v51, %v3239_v56  ;;  %v1745_v31 = vmul.f32 %v2569_v51, %v3242_v0  ;;  %1763 = vst [vmem:[%s3297_s5 + $0x30] sm:$0xff] %v1699_v45  ;;  %v1747_v47 = vmul.f32 %v2569_v51, %v3245_v61  ;;  %v1749_v42 = vmul.f32 %v2569_v51, %v3250_v44  ;;  %v3636_v56 = vld [vmem:[#allocation10_spill] sm:$0xff]  ;;  %v3637_v0 = vld [vmem:[#allocation11_spill] sm:$0xff] }
 0x346   : > { %v1751_v21 = vmul.f32 %v2569_v51, %v3253_v5  ;;  %v1753_v53 = vmul.f32 %v2569_v51, %v3258_v27  ;;  %1765 = vst [vmem:[%s3297_s5 + $0x40] sm:$0xff] %v1701_v54  ;;  %v1711_v59 = vmul.f32 %v2569_v51, %v3151_v35  ;;  %v1713_v11 = vmul.f32 %v2569_v51, %v3156_v19  ;;  %v3638_v5 = vld [vmem:[#allocation12_spill] sm:$0xff]  ;;  %v3640_v19 = vld [vmem:[#allocation14_spill] sm:$0xff] }
 0x347   : > { %1767 = vst [vmem:[%s3297_s5 + $0x50] sm:$0xff] %v1703_v15  ;;  %v1406_v61 = vmax.f32 %v1404_v20, %v3636_v56  ;;  %v1407_v44 = vmax.f32 %v1405_v43, %v3637_v0 }
 0x348   : > { %1769 = vst [vmem:[%s3297_s5 + $0x60] sm:$0xff] %v1705_v16 }
 0x349   : > { %1771 = vst [vmem:[%s3297_s5 + $0x70] sm:$0xff] %v1707_v41  ;;  %v1408_v27 = vmax.f32 %v1406_v61, %v3638_v5  ;;  %v1409_v35 = vmax.f32 %v1407_v44, %v3639_v24 }
 0x34a   : > { %v3338_v57 = vpop.f32.mrf.mxu3  ;;  %1773 = vst [vmem:[%s3297_s5 + $0x80] sm:$0xff] %v1709_v34 }
 0x34b   : > { %1775 = vst [vmem:[%s3297_s5 + $0x90] sm:$0xff] %v1711_v59  ;;  %v1410_v51 = vmax.f32 %v1408_v27, %v3640_v19  ;;  %v1411_v25 = vmax.f32 %v1409_v35, %v3641_v1 }
 0x34c   : > { %1777 = vst [vmem:[%s3297_s5 + $0xa0] sm:$0xff] %v1713_v11 }
 0x34d   : > { %1779 = vst [vmem:[%s3297_s5 + $0xb0] sm:$0xff] %v1715_v18  ;;  %v1412_v20 = vmax.f32 %v1410_v51, %v3642_v52  ;;  %v1413_v4 = vmax.f32 %v1411_v25, %v3270_v9 }
 0x34e   : > { %1781 = vst [vmem:[%s3297_s5 + $0xc0] sm:$0xff] %v1717_v49 }
 0x34f   : > { %1783 = vst [vmem:[%s3297_s5 + $0xd0] sm:$0xff] %v1719_v40  ;;  %v1414_v45 = vmax.f32 %v1412_v20, %v3281_v46  ;;  %v1415_v54 = vmax.f32 %v1413_v4, %v3304_v6 }
 0x350   : > { %1785 = vst [vmem:[%s3297_s5 + $0xe0] sm:$0xff] %v1721_v23 }
 0x351   : > { %1787 = vst [vmem:[%s3297_s5 + $0xf0] sm:$0xff] %v1723_v63  ;;  %v1416_v15 = vmax.f32 %v1414_v45, %v3338_v57 }
 0x352   : > { %v3356_v43 = vpop.f32.mrf.mxu3  ;;  %1789 = vst [vmem:[%s3297_s5 + $0x100] sm:$0xff] %v1725_v22  ;;  %v3643_v22 = vld [vmem:[#allocation16_spill] sm:$0xff] }
 0x353   : > { %v1417_v16 = vmax.f32 %v1415_v54, %v3356_v43  ;;  %1791 = vst [vmem:[%s3297_s5 + $0x110] sm:$0xff] %v1727_v8 }
 0x354   : > { %1793 = vst [vmem:[%s3297_s5 + $0x120] sm:$0xff] %v1729_v29 }
 0x355   : > { %v1418_v41 = vmax.f32 %v1416_v15, %v1417_v16  ;;  %1795 = vst [vmem:[%s3297_s5 + $0x130] sm:$0xff] %v1731_v3  ;;  %v3644_v3 = vld [vmem:[#allocation7_spill] sm:$0xff] }
 0x356   : > { %1797 = vst [vmem:[%s3297_s5 + $0x140] sm:$0xff] %v1733_v28 }
 0x357   : > { %v1419_v34 = vrot.slane %v1418_v41, 4  ;;  %1799 = vst [vmem:[%s3297_s5 + $0x150] sm:$0xff] %v1735_v36  ;;  %v3645_v36 = vld [vmem:[#allocation8_spill] sm:$0xff] }
 0x358   : > { %1801 = vst [vmem:[%s3297_s5 + $0x160] sm:$0xff] %v1737_v10 }
 0x359   : > { %v1420_v18 = vmax.f32 %v1418_v41, %v1419_v34  ;;  %1803 = vst [vmem:[%s3297_s5 + $0x170] sm:$0xff] %v1739_v37 }
 0x35a   : > { %1805 = vst [vmem:[%s3297_s5 + $0x180] sm:$0xff] %v1741_v32 }
 0x35b   : > { %v1421_v49 = vrot.slane %v1420_v18, 2  ;;  %1807 = vst [vmem:[%s3297_s5 + $0x190] sm:$0xff] %v1743_v50  ;;  %v3646_v50 = vld [vmem:[#allocation9_spill] sm:$0xff] }
 0x35c   : > { %1809 = vst [vmem:[%s3297_s5 + $0x1a0] sm:$0xff] %v1745_v31 }
 0x35d   : > { %v1422_v40 = vmax.f32 %v1420_v18, %v1421_v49  ;;  %1811 = vst [vmem:[%s3297_s5 + $0x1b0] sm:$0xff] %v1747_v47 }
 0x35e   : > { %1813 = vst [vmem:[%s3297_s5 + $0x1c0] sm:$0xff] %v1749_v42 }
 0x35f   : > { %v1423_v23 = vrot.slane %v1422_v40, 1  ;;  %1815 = vst [vmem:[%s3297_s5 + $0x1d0] sm:$0xff] %v1751_v21 }
 0x360   : > { %1817 = vst [vmem:[%s3297_s5 + $0x1e0] sm:$0xff] %v1753_v53 }
 0x361   : > { %v3375_v63 = vmax.f32 %v1422_v40, %v1423_v23 }
 0x363   : > { %v1426_v8 = vsub.f32 %v3643_v22, %v3375_v63  ;;  %v1428_v29 = vsub.f32 %v3265_v39, %v3375_v63  ;;  %v1430_v28 = vsub.f32 %v3644_v3, %v3375_v63  ;;  %v1432_v10 = vsub.f32 %v3645_v36, %v3375_v63 }
 0x364   : > { %v1434_v31 = vsub.f32 %v3646_v50, %v3375_v63  ;;  %v1436_v42 = vsub.f32 %v3010_v55, %v3375_v63  ;;  %v1438_v39 = vsub.f32 %v3014_v58, %v3375_v63  ;;  %v1440_v59 = vsub.f32 %v3018_v60, %v3375_v63 }
 0x365   : > { %v1491_v37 = vmul.f32 1.442695, %v1426_v8  ;;  %v1495_v32 = vmul.f32 1.442695, %v1428_v29  ;;  %v1499_v47 = vmul.f32 1.442695, %v1430_v28  ;;  %v1442_v27 = vsub.f32 %v3022_v62, %v3375_v63 }
 0x366   : > { %v1503_v21 = vmul.f32 1.442695, %v1432_v10  ;;  %v1507_v53 = vmul.f32 1.442695, %v1434_v31  ;;  %v1511_v11 = vmul.f32 1.442695, %v1436_v42  ;;  %v1444_v51 = vsub.f32 %v3026_v2, %v3375_v63 }
 0x367   : > { %2570 = vpow2.f32 %v1491_v37  ;;  %v1515_v55 = vmul.f32 1.442695, %v1438_v39  ;;  %v1519_v60 = vmul.f32 1.442695, %v1440_v59  ;;  %v1446_v4 = vsub.f32 %v3032_v7, %v3375_v63 }
 0x368   : > { %2572 = vpow2.f32 %v1495_v32  ;;  %v1523_v62 = vmul.f32 1.442695, %v1442_v27  ;;  %v1448_v15 = vsub.f32 %v3040_v17, %v3375_v63  ;;  %v1527_v2 = vmul.f32 1.442695, %v1444_v51 }
 0x369   : > { %2574 = vpow2.f32 %v1499_v47  ;;  %v1450_v34 = vsub.f32 %v3048_v38, %v3375_v63  ;;  %v1531_v7 = vmul.f32 1.442695, %v1446_v4  ;;  %v1452_v40 = vsub.f32 %v3056_v33, %v3375_v63 }
 0x36a   : > { %2576 = vpow2.f32 %v1503_v21  ;;  %v1535_v17 = vmul.f32 1.442695, %v1448_v15  ;;  %v1454_v8 = vsub.f32 %v3070_v13, %v3375_v63  ;;  %v1456_v28 = vsub.f32 %v3080_v30, %v3375_v63 }
 0x36b   : > { %2578 = vpow2.f32 %v1507_v53  ;;  %v1539_v38 = vmul.f32 1.442695, %v1450_v34  ;;  %v1543_v33 = vmul.f32 1.442695, %v1452_v40  ;;  %v1458_v37 = vsub.f32 %v3082_v48, %v3375_v63 }
 0x36c   : > { %2580 = vpow2.f32 %v1511_v11  ;;  %v1547_v13 = vmul.f32 1.442695, %v1454_v8  ;;  %v1460_v31 = vsub.f32 %v3090_v12, %v3375_v63  ;;  %v1551_v30 = vmul.f32 1.442695, %v1456_v28 }
 0x36d   : > { %v3393_v61 = vpop.eup %2570  ;;  %2582 = vpow2.f32 %v1515_v55  ;;  %v1462_v21 = vsub.f32 %v3100_v26, %v3375_v63  ;;  %v1555_v48 = vmul.f32 1.442695, %v1458_v37  ;;  %v1464_v59 = vsub.f32 %v3121_v14, %v3375_v63 }
 0x36e   : > { %v3395_v44 = vpop.eup %2572  ;;  %2584 = vpow2.f32 %v1519_v60  ;;  %v1559_v12 = vmul.f32 1.442695, %v1460_v31  ;;  %v1466_v55 = vsub.f32 %v3636_v56, %v3375_v63  ;;  %v1468_v60 = vsub.f32 %v3637_v0, %v3375_v63 }
 0x36f   : > { %v1654_v35 = vadd.f32 %v3395_v44, %v3393_v61  ;;  %v3401_v58 = vpop.eup %2574  ;;  %2586 = vpow2.f32 %v1523_v62  ;;  %v1563_v26 = vmul.f32 1.442695, %v1462_v21  ;;  %v1567_v14 = vmul.f32 1.442695, %v1464_v59 }
 0x370   : > { %v3406_v20 = vpop.eup %2576  ;;  %2588 = vpow2.f32 %v1527_v2  ;;  %v1470_v62 = vsub.f32 %v3638_v5, %v3375_v63  ;;  %v1571_v56 = vmul.f32 1.442695, %v1466_v55  ;;  %v1472_v2 = vsub.f32 %v3639_v24, %v3375_v63 }
 0x371   : > { %v1655_v25 = vadd.f32 %v3401_v58, %v1654_v35  ;;  %v3411_v54 = vpop.eup %2578  ;;  %2590 = vpow2.f32 %v1531_v7  ;;  %v1575_v0 = vmul.f32 1.442695, %v1468_v60  ;;  %v1474_v7 = vsub.f32 %v3640_v19, %v3375_v63 }
 0x372   : > { %v3416_v41 = vpop.eup %2580  ;;  %2592 = vpow2.f32 %v1535_v17  ;;  %v1579_v5 = vmul.f32 1.442695, %v1470_v62  ;;  %v1476_v17 = vsub.f32 %v3641_v1, %v3375_v63  ;;  %v1583_v24 = vmul.f32 1.442695, %v1472_v2 }
 0x373   : > { %v1656_v45 = vadd.f32 %v3406_v20, %v1655_v25  ;;  %v3421_v49 = vpop.eup %2582  ;;  %2594 = vpow2.f32 %v1539_v38  ;;  %v1478_v38 = vsub.f32 %v3642_v52, %v3375_v63  ;;  %v1587_v19 = vmul.f32 1.442695, %v1474_v7 }
 0x374   : > { %v3426_v22 = vpop.eup %2584  ;;  %2596 = vpow2.f32 %v1543_v33  ;;  %v1480_v33 = vsub.f32 %v3270_v9, %v3375_v63  ;;  %v1591_v1 = vmul.f32 1.442695, %v1476_v17 }
 0x375   : > { %v1657_v16 = vadd.f32 %v3411_v54, %v1656_v45  ;;  %v3431_v3 = vpop.eup %2586  ;;  %2598 = vpow2.f32 %v1547_v13  ;;  %v1482_v13 = vsub.f32 %v3281_v46, %v3375_v63  ;;  %v1595_v52 = vmul.f32 1.442695, %v1478_v38 }
 0x376   : > { %v3436_v10 = vpop.eup %2588  ;;  %2600 = vpow2.f32 %v1551_v30  ;;  %v1484_v30 = vsub.f32 %v3304_v6, %v3375_v63  ;;  %v1599_v9 = vmul.f32 1.442695, %v1480_v33 }
 0x377   : > { %v1658_v18 = vadd.f32 %v3416_v41, %v1657_v16  ;;  %v3441_v50 = vpop.eup %2590  ;;  %2602 = vpow2.f32 %v1555_v48  ;;  %v1486_v48 = vsub.f32 %v3338_v57, %v3375_v63  ;;  %v1603_v46 = vmul.f32 1.442695, %v1482_v13 }
 0x378   : > { %v3446_v42 = vpop.eup %2592  ;;  %2604 = vpow2.f32 %v1559_v12  ;;  %v1488_v12 = vsub.f32 %v3356_v43, %v3375_v63 }
 0x379   : > { %v1659_v23 = vadd.f32 %v3421_v49, %v1658_v18  ;;  %v3451_v53 = vpop.eup %2594  ;;  %2606 = vpow2.f32 %v1563_v26  ;;  %v1611_v26 = vmul.f32 1.442695, %v1486_v48 }
 0x37a   : > { %v3456_v27 = vpop.eup %2596  ;;  %2608 = vpow2.f32 %v1567_v14  ;;  %v1615_v14 = vmul.f32 1.442695, %v1488_v12 }
 0x37b   : > { %v1660_v29 = vadd.f32 %v3426_v22, %v1659_v23  ;;  %v3461_v51 = vpop.eup %2598  ;;  %2610 = vpow2.f32 %v1571_v56 }
 0x37c   : > { %v3466_v4 = vpop.eup %2600  ;;  %2612 = vpow2.f32 %v1575_v0 }
 0x37d   : > { %v1661_v36 = vadd.f32 %v3431_v3, %v1660_v29  ;;  %v3471_v15 = vpop.eup %2602  ;;  %2614 = vpow2.f32 %v1579_v5 }
 0x37e   : > { %v3476_v34 = vpop.eup %2604  ;;  %2616 = vpow2.f32 %v1583_v24 }
 0x37f   : > { %v1662_v32 = vadd.f32 %v3436_v10, %v1661_v36  ;;  %v3481_v40 = vpop.eup %2606  ;;  %2618 = vpow2.f32 %v1587_v19 }
 0x380   : > { %v3486_v8 = vpop.eup %2608  ;;  %2620 = vpow2.f32 %v1591_v1 }
 0x381   : > { %v1663_v47 = vadd.f32 %v3441_v50, %v1662_v32  ;;  %v3491_v28 = vpop.eup %2610  ;;  %2622 = vpow2.f32 %v1595_v52 }
 0x382   : > { %v3496_v37 = vpop.eup %2612  ;;  %2624 = vpow2.f32 %v1599_v9 }
 0x383   : > { %v1664_v39 = vadd.f32 %v3446_v42, %v1663_v47  ;;  %v3501_v31 = vpop.eup %2614  ;;  %2626 = vpow2.f32 %v1603_v46 }
 0x384   : > { %v3506_v21 = vpop.eup %2616 }
 0x385   : > { %v1665_v11 = vadd.f32 %v3451_v53, %v1664_v39  ;;  %v2619_v59 = vpop.eup %2618 }
 0x386   : > { %v2621_v55 = vpop.eup %2620 }
 0x387   : > { %v1666_v35 = vadd.f32 %v3456_v27, %v1665_v11  ;;  %v1607_v11 = vmul.f32 1.442695, %v1484_v30  ;;  %v2623_v60 = vpop.eup %2622 }
 0x388   : > { %v2625_v57 = vpop.eup %2624 }
 0x389   : > { %v1667_v25 = vadd.f32 %v3461_v51, %v1666_v35  ;;  %2628 = vpow2.f32 %v1607_v11  ;;  %v2627_v56 = vpop.eup %2626 }
 0x38a   : > { %2630 = vpow2.f32 %v1611_v26 }
 0x38b   : > { %v1668_v45 = vadd.f32 %v3466_v4, %v1667_v25  ;;  %2632 = vpow2.f32 %v1615_v14 }
 0x38d   : > { %v1669_v16 = vadd.f32 %v3471_v15, %v1668_v45 }
 0x38f   : > { %v1670_v18 = vadd.f32 %v3476_v34, %v1669_v16  ;;  %v2629_v2 = vpop.eup %2628 }
 0x390   : > { %v2631_v43 = vpop.eup %2630 }
 0x391   : > { %v1671_v23 = vadd.f32 %v3481_v40, %v1670_v18  ;;  %v2633_v16 = vpop.eup %2632 }
 0x393   : > { %v1672_v29 = vadd.f32 %v3486_v8, %v1671_v23 }
 0x395   : > { %v1673_v36 = vadd.f32 %v3491_v28, %v1672_v29 }
 0x397   : > { %v1674_v32 = vadd.f32 %v3496_v37, %v1673_v36 }
 0x399   : > { %v1675_v47 = vadd.f32 %v3501_v31, %v1674_v32 }
 0x39b   : > { %v1676_v39 = vadd.f32 %v3506_v21, %v1675_v47 }
 0x39d   : > { %v1677_v6 = vadd.f32 %v2619_v59, %v1676_v39 }
 0x39f   : > { %v1678_v35 = vadd.f32 %v2621_v55, %v1677_v6 }
 0x3a1   : > { %v1679_v25 = vadd.f32 %v2623_v60, %v1678_v35 }
 0x3a3   : > { %v1680_v62 = vadd.f32 %v2625_v57, %v1679_v25 }
 0x3a5   : > { %v1681_v45 = vadd.f32 %v2627_v56, %v1680_v62 }
 0x3a7   : > { %v1682_v0 = vadd.f32 %v2629_v2, %v1681_v45 }
 0x3a9   : > { %v1683_v63 = vadd.f32 %v2631_v43, %v1682_v0 }
 0x3ab   : > { %v1684_v7 = vadd.f32 %v2633_v16, %v1683_v63 }
 0x3ad   : > { %v1685_v5 = vrot.slane %v1684_v7, 4 }
 0x3af   : > { %v1686_v18 = vadd.f32 %v1685_v5, %v1684_v7 }
 0x3b1   : > { %v1687_v17 = vrot.slane %v1686_v18, 2 }
 0x3b3   : > { %v1688_v24 = vadd.f32 %v1687_v17, %v1686_v18 }
 0x3b5   : > { %v1689_v23 = vrot.slane %v1688_v24, 1 }
 0x3b7   : > { %v1690_v38 = vadd.f32 %v1689_v23, %v1688_v24 }
 0x3b9   : > { %2634 = vrcp.f32 %v1690_v38 }
 0x3bf   : > { %v2635_v19 = vpop.eup %2634 }
 0x3c0   : > { %v1756_v29 = vmul.f32 %v2635_v19, %v2633_v16  ;;  %v1694_v33 = vmul.f32 %v2635_v19, %v3393_v61  ;;  %v1696_v1 = vmul.f32 %v2635_v19, %v3395_v44  ;;  %v1698_v36 = vmul.f32 %v2635_v19, %v3401_v58 }
 0x3c1   : > { %v1700_v13 = vmul.f32 %v2635_v19, %v3406_v20  ;;  %v1702_v52 = vmul.f32 %v2635_v19, %v3411_v54  ;;  %v1704_v32 = vmul.f32 %v2635_v19, %v3416_v41  ;;  %v1706_v30 = vmul.f32 %v2635_v19, %v3421_v49 }
 0x3c2   : > { %1820 = vst [vmem:[%s3297_s5 + $0x1f8] sm:$0xff] %v1756_v29  ;;  %v1708_v9 = vmul.f32 %v2635_v19, %v3426_v22  ;;  %v1710_v47 = vmul.f32 %v2635_v19, %v3431_v3  ;;  %v1716_v61 = vmul.f32 %v2635_v19, %v3446_v42  ;;  %v1718_v44 = vmul.f32 %v2635_v19, %v3451_v53 }
 0x3c3   : > { %v1720_v58 = vmul.f32 %v2635_v19, %v3456_v27  ;;  %v1722_v20 = vmul.f32 %v2635_v19, %v3461_v51  ;;  %1758 = vst [vmem:[%s3297_s5 + $0x8] sm:$0xff] %v1694_v33  ;;  %v1724_v54 = vmul.f32 %v2635_v19, %v3466_v4  ;;  %v1726_v41 = vmul.f32 %v2635_v19, %v3471_v15 }
 0x3c4   : > { %v1728_v49 = vmul.f32 %v2635_v19, %v3476_v34  ;;  %v1730_v22 = vmul.f32 %v2635_v19, %v3481_v40  ;;  %1760 = vst [vmem:[%s3297_s5 + $0x18] sm:$0xff] %v1696_v1  ;;  %v1732_v3 = vmul.f32 %v2635_v19, %v3486_v8  ;;  %v1734_v42 = vmul.f32 %v2635_v19, %v3491_v28 }
 0x3c5   : > { %v1736_v53 = vmul.f32 %v2635_v19, %v3496_v37  ;;  %v1738_v27 = vmul.f32 %v2635_v19, %v3501_v31  ;;  %1762 = vst [vmem:[%s3297_s5 + $0x28] sm:$0xff] %v1698_v36  ;;  %v1740_v51 = vmul.f32 %v2635_v19, %v3506_v21  ;;  %v1742_v4 = vmul.f32 %v2635_v19, %v2619_v59 }
 0x3c6   : > { %v1744_v15 = vmul.f32 %v2635_v19, %v2621_v55  ;;  %v1746_v34 = vmul.f32 %v2635_v19, %v2623_v60  ;;  %1764 = vst [vmem:[%s3297_s5 + $0x38] sm:$0xff] %v1700_v13  ;;  %v1748_v40 = vmul.f32 %v2635_v19, %v2625_v57  ;;  %v1750_v8 = vmul.f32 %v2635_v19, %v2627_v56 }
 0x3c7   : > { %v1752_v28 = vmul.f32 %v2635_v19, %v2629_v2  ;;  %v1754_v37 = vmul.f32 %v2635_v19, %v2631_v43  ;;  %1766 = vst [vmem:[%s3297_s5 + $0x48] sm:$0xff] %v1702_v52  ;;  %v1712_v31 = vmul.f32 %v2635_v19, %v3436_v10  ;;  %v1714_v21 = vmul.f32 %v2635_v19, %v3441_v50 }
 0x3c8   : > { %1768 = vst [vmem:[%s3297_s5 + $0x58] sm:$0xff] %v1704_v32 }
 0x3c9   : > { %1770 = vst [vmem:[%s3297_s5 + $0x68] sm:$0xff] %v1706_v30 }
 0x3ca   : > { %1772 = vst [vmem:[%s3297_s5 + $0x78] sm:$0xff] %v1708_v9 }
 0x3cb   : > { %1774 = vst [vmem:[%s3297_s5 + $0x88] sm:$0xff] %v1710_v47 }
 0x3cc   : > { %1776 = vst [vmem:[%s3297_s5 + $0x98] sm:$0xff] %v1712_v31 }
 0x3cd   : > { %1778 = vst [vmem:[%s3297_s5 + $0xa8] sm:$0xff] %v1714_v21 }
 0x3ce   : > { %1780 = vst [vmem:[%s3297_s5 + $0xb8] sm:$0xff] %v1716_v61 }
 0x3cf   : > { %1782 = vst [vmem:[%s3297_s5 + $0xc8] sm:$0xff] %v1718_v44 }
 0x3d0   : > { %1784 = vst [vmem:[%s3297_s5 + $0xd8] sm:$0xff] %v1720_v58 }
 0x3d1   : > { %1786 = vst [vmem:[%s3297_s5 + $0xe8] sm:$0xff] %v1722_v20 }
 0x3d2   : > { %1788 = vst [vmem:[%s3297_s5 + $0xf8] sm:$0xff] %v1724_v54 }
 0x3d3   : > { %1790 = vst [vmem:[%s3297_s5 + $0x108] sm:$0xff] %v1726_v41 }
 0x3d4   : > { %1792 = vst [vmem:[%s3297_s5 + $0x118] sm:$0xff] %v1728_v49 }
 0x3d5   : > { %1794 = vst [vmem:[%s3297_s5 + $0x128] sm:$0xff] %v1730_v22 }
 0x3d6   : > { %1796 = vst [vmem:[%s3297_s5 + $0x138] sm:$0xff] %v1732_v3 }
 0x3d7   : > { %1798 = vst [vmem:[%s3297_s5 + $0x148] sm:$0xff] %v1734_v42 }
 0x3d8   : > { %1800 = vst [vmem:[%s3297_s5 + $0x158] sm:$0xff] %v1736_v53 }
 0x3d9   : > { %1802 = vst [vmem:[%s3297_s5 + $0x168] sm:$0xff] %v1738_v27 }
 0x3da   : > { %1804 = vst [vmem:[%s3297_s5 + $0x178] sm:$0xff] %v1740_v51 }
 0x3db   : > { %1806 = vst [vmem:[%s3297_s5 + $0x188] sm:$0xff] %v1742_v4 }
 0x3dc   : > { %1808 = vst [vmem:[%s3297_s5 + $0x198] sm:$0xff] %v1744_v15 }
 0x3dd   : > { %1810 = vst [vmem:[%s3297_s5 + $0x1a8] sm:$0xff] %v1746_v34 }
 0x3de   : > { %1812 = vst [vmem:[%s3297_s5 + $0x1b8] sm:$0xff] %v1748_v40 }
 0x3df   : > { %1814 = vst [vmem:[%s3297_s5 + $0x1c8] sm:$0xff] %v1750_v8 }
 0x3e0   : > { %1816 = vst [vmem:[%s3297_s5 + $0x1d8] sm:$0xff] %v1752_v28 }
 0x3e1   : > { %1818 = vst [vmem:[%s3297_s5 + $0x1e8] sm:$0xff] %v1754_v37 }
 0x3e2   : > { %2663 = shalt.err (!%p2660_p5)
}
 0x3e3   : > { %s2716_s29 = smov 256   ;;  %s2717_s30 = smov 16  }
 0x3e4   : > { %2447 = dma.vmem_to_hbm [thread:$0]  (%p2778_p4), %s1837_s10, 8192, %s1839_s11, %s1822_s15, %s2716_s29, %s2716_s29, %s2717_s30  }
 0x3e5 PF: > { %p2453_p6 = scmp.ge.s32.totalorder %s2714_s17, 2  ;;  %s1853_s4 = sand.u32 1, %s2694_s12  }
 0x3e6   : > { %s1854_s5 = scalar_lea.sflag [#allocation5], %s1853_s4 }
 0x3e7   : > { %p2450_p7 = pnand %p2453_p6, %p2785_p8 }
 0x3e9   : > { %p2451_p9 = pneg %p2450_p7 }
 0x3eb   : > { %2689 = dma.done.wait (%p2451_p9), %s1854_s5, 8192  }
 0x3ec   : > { %2691 = vsyncadd (%p2451_p9), %s1854_s5, 4294959104  ;;  %s16_s17 = sadd.s32 1, %s2714_s17   ;;  %s3647_s12 = smov %s2698_s13 }
 0x3ed   : > { %p13_p10 = scmp.ge.s32.totalorder %s16_s17, 4   ;;  %s3648_s13 = smov %s2702_s14 }
 0x3ee   : > { %s3649_s14 = smov %s2791_s25  ;;  %s3650_s15 = smov %s2710_s16 }
 0x3ef   : > { %s3651_s16 = smov %s3653_s20  ;;  %15 = sbr.rel (!%p13_p10) target bundleno = 4 (0x4), region = 72 }
 0x3f4   :  { %1860 = vsyncpa [#allocation5], 1 }
 0x3f5   :  { %1862 = vsyncpa [#allocation5 + $0x1], 1 }

</bundles_post_ra>
